<compile_context>
chip_gen: v7x
topology: tpu7x:2x2x1
jax: 0.10.0
libtpu: 0.0.40
codegen_flags: <defaults>
</compile_context>

<pallas_src>
import jax
import jax.numpy as jnp
from jax.experimental import pallas as pl
from jax.experimental.pallas import tpu as pltpu


def _round_up(x, m):
    return (x + m - 1) // m * m


def _resident_spec(shape):
    nd = len(shape)
    return pl.BlockSpec(shape, lambda i, _nd=nd: (0,) * _nd)


def _make_kernel(num_cat, ncvp, num_shifts, tb):
    def kernel(xin_ref, wg_ref, pw64_ref, pb64_ref, bw1e_ref, bb1e_ref,
               bw2_ref, bb2_ref, perms_ref, wints_ref, tw1d_ref, tb1_ref,
               tw2t_ref, tb2_ref, o_ref):
        xin = xin_ref[...]                                   # (TB, num_cat+1) f32
        price = xin[:, num_cat:num_cat + 1]                  # (TB, 1)
        idx = xin[:, :num_cat].astype(jnp.int32)             # exact small ints

        # Fused embedding gather: one-hot (VPU compares vs. a lane iota) times the
        # VMEM-resident block-diagonal table stack (MXU).  Globalized ids live in
        # disjoint lane ranges, so summing the per-field compares yields the
        # combined one-hot with no gathers and no concatenations.
        lane = jax.lax.broadcasted_iota(jnp.int32, (tb, ncvp), 1)
        onehot = jnp.zeros((tb, ncvp), jnp.float32)
        for i in range(num_cat):
            onehot += (idx[:, i:i + 1] == lane).astype(jnp.float32)

        # emb = [e_0 | e_1 | ... | dense]  (lane-dense (TB, F*D), no concat):
        # the gather matmul fills the categorical blocks; the price FMA fills the
        # dense block (pw64/pb64 are zero outside the last D lanes).
        emb = (jnp.dot(onehot, wg_ref[...], preferred_element_type=jnp.float32)
               + price * pw64_ref[...] + pb64_ref[...])      # (TB, F*D)

        # Bottom MLP.  Layer 1 is folded into a price FMA:
        #   dense @ bw1 == price*(pw@bw1) + (pb@bw1)   (precomputed in wrapper).
        h = jnp.maximum(price * bw1e_ref[...] + bb1e_ref[...], 0.0)          # (TB, H1)
        h = jnp.maximum(
            jnp.dot(h, bw2_ref[...], preferred_element_type=jnp.float32)
            + bb2_ref[...], 0.0)                                             # (TB, H2)

        # Top layer 1, contraction split into (a) bottom-MLP rows and (b) the
        # cyclic-shift interaction slabs.  For shift s, block j of the product
        # slab is f_j * f_{(j+s)%F}; shifts s=1..F//2 cover every unordered pair
        # (the F/2 shift covers its pairs twice when F is even, so the wrapper
        # halves those weight rows).  Summation over the embedding dim is folded
        # into the MXU contraction against the D-row-repeated tw1i weights.
        acc = (jnp.dot(h, tw1d_ref[...], preferred_element_type=jnp.float32)
               + tb1_ref[...])                                               # (TB, TH)
        for s in range(num_shifts):
            permuted = jnp.dot(emb, perms_ref[s],
                               preferred_element_type=jnp.float32)           # (TB, F*D)
            acc += jnp.dot(emb * permuted, wints_ref[s],
                           preferred_element_type=jnp.float32)
        t = jnp.maximum(acc, 0.0)                                            # (TB, TH)

        # Top layer 2, emitted with batch on the LANE axis (lane-dense (1, TB)
        # output row instead of a masked 1-lane (TB, 1) column):
        #   out = tw2^T @ t^T + tb2   (same contraction pattern as q @ k^T).
        out_row = jax.lax.dot_general(
            tw2t_ref[...], t, (((1,), (1,)), ((), ())),
            preferred_element_type=jnp.float32) + tb2_ref[...]               # (1, TB)
        o_ref[0] = out_row

    return kernel


def dlrm_forward(params, x_cat, price, *, max_batch_tile=2048):
    """Pallas implementation of DLRM.forward.

    x_cat : int32  [num_cat_fields, batch]
    price : float32 [batch]
    returns: float32 [batch]
    """
    emb_tables = params["emb_tables"]
    num_cat = len(emb_tables)
    F = num_cat + 1
    D = emb_tables[0].shape[1]
    FD = F * D
    B = price.shape[0]
    H1 = params["bw1"].shape[1]
    H2 = params["bw2"].shape[1]
    TH = params["tw1d"].shape[1]
    assert params["tw2"].shape[1] == 1, "top MLP must end in a single output"

    # ---- batch tiling: large tile to amortize per-step overhead, but keep >=2
    # grid steps when the batch allows so dimension_semantics=("parallel",) can
    # shard the batch axis across v7x's two TensorCores.
    b8 = _round_up(B, 8)
    tb = min(max_batch_tile, b8)
    if tb == b8 and tb >= 256:
        tb = _round_up((b8 + 1) // 2, 8)
    b_pad = _round_up(B, tb)
    grid = (b_pad // tb,)

    # ---- fused-gather operands -------------------------------------------
    # Tiny vocabularies: keep all tables VMEM-resident (constant index_map) and
    # gather in-kernel with a one-hot MXU matmul.
    # TODO(synk): for production-size tables switch to memory_space=pl.ANY +
    # make_async_copy row gathers (double buffered) instead of the one-hot matmul.
    vp = [_round_up(t.shape[0], 8) for t in emb_tables]
    offs = [0]
    for v in vp[:-1]:
        offs.append(offs[-1] + v)
    ncvp = sum(vp)
    wg = jnp.zeros((ncvp, FD), jnp.float32)
    for i, tab in enumerate(emb_tables):
        wg = wg.at[offs[i]:offs[i] + tab.shape[0], i * D:(i + 1) * D].set(
            tab.astype(jnp.float32))
    # price feature occupies the last D lanes of `emb`; delivered by a VPU FMA.
    pw64 = jnp.zeros((1, FD), jnp.float32).at[:, num_cat * D:].set(params["pw"])
    pb64 = jnp.zeros((1, FD), jnp.float32).at[:, num_cat * D:].set(params["pb"])

    # bottom-MLP layer-1 folded into a price FMA (exact).
    bw1e = params["pw"] @ params["bw1"]                          # (1, H1)
    bb1e = params["pb"] @ params["bw1"] + params["bb1"]          # (1, H1)

    # cyclic-shift interaction operands: block-rotation permutation matrices P_s
    # and D-row-repeated (and, for the F/2 shift, halved) top-layer-1 weights.
    pair_idx = {}
    k = 0
    for i in range(F):
        for j in range(i + 1, F):
            pair_idx[(i, j)] = k
            k += 1
    num_shifts = F // 2
    eye_d = jnp.eye(D, dtype=jnp.float32)
    perms, wints = [], []
    for s in range(1, num_shifts + 1):
        p_s = jnp.zeros((FD, FD), jnp.float32)
        w_s = jnp.zeros((FD, TH), jnp.float32)
        scale = 0.5 if (F % 2 == 0 and s == F // 2) else 1.0
        for j in range(F):
            src = (j + s) % F
            # (emb @ p_s)[:, block j] = emb[:, block src]
            p_s = p_s.at[src * D:(src + 1) * D, j * D:(j + 1) * D].set(eye_d)
            w_row = params["tw1i"][pair_idx[(min(j, src), max(j, src))]]     # (TH,)
            w_s = w_s.at[j * D:(j + 1) * D, :].set(
                scale * jnp.broadcast_to(w_row, (D, TH)))
        perms.append(p_s)
        wints.append(w_s)
    perms = jnp.stack(perms)                                     # (S, FD, FD)
    wints = jnp.stack(wints)                                     # (S, FD, TH)
    tw2t = params["tw2"].T                                       # (1, TH)

    # ---- single streamed per-row input: globalized ids (exact as f32) + price.
    offs_arr = jnp.asarray(offs, jnp.int32)
    idx_glob = x_cat.T.astype(jnp.int32) + offs_arr[None, :]     # (B, num_cat)
    xin = jnp.concatenate(
        [idx_glob.astype(jnp.float32),
         price.reshape(B, 1).astype(jnp.float32)], axis=1)       # (B, num_cat+1)
    if b_pad != B:
        xin = jnp.pad(xin, ((0, b_pad - B), (0, 0)))             # pad rows harmless

    weights = (wg, pw64, pb64, bw1e, bb1e, params["bw2"], params["bb2"],
               perms, wints, params["tw1d"], params["tb1"], tw2t, params["tb2"])

    per_row = (num_cat * ncvp + 2 * ncvp * FD + 2 * FD
               + 2 * H1 + 2 * H1 * H2 + 2 * H2 * TH
               + num_shifts * (2 * FD * FD + FD + 2 * FD * TH)
               + 2 * TH)
    flops = int(b_pad * per_row)
    bytes_accessed = int(xin.size * 4 + b_pad * 4
                         + sum(int(w.size) * 4 for w in weights))

    kernel = _make_kernel(num_cat, ncvp, num_shifts, tb)

    out = pl.pallas_call(
        kernel,
        out_shape=jax.ShapeDtypeStruct((grid[0], 1, tb), jnp.float32),
        grid=grid,
        in_specs=[pl.BlockSpec((tb, num_cat + 1), lambda i: (i, 0))]
                 + [_resident_spec(w.shape) for w in weights],
        # Lane-dense output: one (1, TB) row per grid step.
        out_specs=pl.BlockSpec((1, 1, tb), lambda i: (i, 0, 0)),
        compiler_params=pltpu.CompilerParams(
            dimension_semantics=("parallel",),
            vmem_limit_bytes=32 * 1024 * 1024),
        cost_estimate=pl.CostEstimate(
            flops=flops, transcendentals=0, bytes_accessed=bytes_accessed),
    )(xin, *weights)

    return out.reshape(b_pad)[:B]


def dlrm_reference(params, x_cat, price):
    """Pure-JAX reference matching PyTorch DLRM.forward semantics."""
    embs = [tab[x_cat[i]] for i, tab in enumerate(params["emb_tables"])]
    dense = price[:, None] * params["pw"] + params["pb"]
    feats = embs + [dense]
    inter = []
    for i in range(len(feats)):
        for j in range(i + 1, len(feats)):
            inter.append(jnp.sum(feats[i] * feats[j], axis=1, keepdims=True))
    inter = jnp.concatenate(inter, axis=1)
    h = jax.nn.relu(dense @ params["bw1"] + params["bb1"])
    h = jax.nn.relu(h @ params["bw2"] + params["bb2"])
    z = jnp.concatenate([inter, h], axis=1)
    tw1 = jnp.concatenate([params["tw1i"], params["tw1d"]], axis=0)
    t = jax.nn.relu(z @ tw1 + params["tb1"])
    return (t @ params["tw2"] + params["tb2"])[:, 0]


def init_params(key, field_dims, embedding_dim=16,
                bottom_mlp_sizes=(64, 32), top_mlp_sizes=(64, 32, 1)):
    num_cat = len(field_dims)
    F = num_cat + 1
    num_inter = F * (F - 1) // 2
    top_in = num_inter + bottom_mlp_sizes[-1]
    D = embedding_dim

    keys = jax.random.split(key, num_cat + 12)
    ki = iter(range(len(keys)))

    def rnd(shape, fan_in):
        bound = 1.0 / jnp.sqrt(jnp.float32(fan_in))
        return jax.random.uniform(keys[next(ki)], shape, jnp.float32, -bound, bound)

    params = {
        "emb_tables": [jax.random.normal(keys[next(ki)], (dim, D), jnp.float32) * 0.1
                       for dim in field_dims.values()],
        # price_proj: Linear(1, D)
        "pw": rnd((1, D), 1), "pb": rnd((1, D), 1),
        # bottom MLP: D -> 64 -> 32 (both ReLU)
        "bw1": rnd((D, bottom_mlp_sizes[0]), D), "bb1": rnd((1, bottom_mlp_sizes[0]), D),
        "bw2": rnd((bottom_mlp_sizes[0], bottom_mlp_sizes[1]), bottom_mlp_sizes[0]),
        "bb2": rnd((1, bottom_mlp_sizes[1]), bottom_mlp_sizes[0]),
        # top MLP (as built by the PyTorch loop): top_in -> 32 -> 1
        # first-layer weight pre-split into interaction rows / bottom-MLP rows
        "tw1i": rnd((num_inter, top_mlp_sizes[1]), top_in),
        "tw1d": rnd((bottom_mlp_sizes[-1], top_mlp_sizes[1]), top_in),
        "tb1": rnd((1, top_mlp_sizes[1]), top_in),
        "tw2": rnd((top_mlp_sizes[1], top_mlp_sizes[2]), top_mlp_sizes[1]),
        "tb2": rnd((1, top_mlp_sizes[2]), top_mlp_sizes[1]),
    }
    return params


if __name__ == "__main__":
    # Keep the pure-JAX reference's f32 matmuls exact so the 2e-4 check is fair.
    jax.config.update("jax_default_matmul_precision", "highest")

    key = jax.random.PRNGKey(0)
    field_dims = {"user": 11, "item": 7, "genre": 5}   # 3 categorical fields
    B, D = 8, 16

    k_param, k_cat, k_price = jax.random.split(key, 3)
    params = init_params(k_param, field_dims, embedding_dim=D)

    cat_keys = jax.random.split(k_cat, len(field_dims))
    x_cat = jnp.stack([jax.random.randint(cat_keys[i], (B,), 0, dim, jnp.int32)
                       for i, dim in enumerate(field_dims.values())], axis=0)   # (3, B)
    price = jax.random.uniform(k_price, (B,), jnp.float32)

    out = dlrm_forward(params, x_cat, price)
    out = jax.block_until_ready(out)

    ref = dlrm_reference(params, x_cat, price)
    assert out.shape == (B,)
    assert jnp.allclose(out, ref, atol=2e-4, rtol=2e-4), (out, ref)

    print("KERNEL_OK")
</pallas_src>

<mosaic_0001>
module attributes {stable_mosaic.version = 11 : i64} {
  func.func @kernel(%arg0: i32, %arg1: memref<8x4xf32, #tpu.memory_space<vmem>>, %arg2: memref<32x64xf32, #tpu.memory_space<vmem>>, %arg3: memref<1x64xf32, #tpu.memory_space<vmem>>, %arg4: memref<1x64xf32, #tpu.memory_space<vmem>>, %arg5: memref<1x64xf32, #tpu.memory_space<vmem>>, %arg6: memref<1x64xf32, #tpu.memory_space<vmem>>, %arg7: memref<64x32xf32, #tpu.memory_space<vmem>>, %arg8: memref<1x32xf32, #tpu.memory_space<vmem>>, %arg9: memref<2x64x64xf32, #tpu.memory_space<vmem>>, %arg10: memref<2x64x32xf32, #tpu.memory_space<vmem>>, %arg11: memref<32x32xf32, #tpu.memory_space<vmem>>, %arg12: memref<1x32xf32, #tpu.memory_space<vmem>>, %arg13: memref<1x32xf32, #tpu.memory_space<vmem>>, %arg14: memref<1x1xf32, #tpu.memory_space<vmem>>, %arg15: memref<1x1x8xf32, #tpu.memory_space<vmem>>) attributes {dimension_semantics = [#tpu.dimension_semantics<parallel>], iteration_bounds = array<i64: 1>, scalar_prefetch = 0 : i64, scratch_operands = 0 : i64, tpu.core_type = #tpu.core_type<tc>, window_params = [{transform_indices = @transform_0, window_bounds = array<i64: 8, 4>}, {pipeline_mode = #tpu.pipeline_mode<synchronous>, transform_indices = @transform_1, window_bounds = array<i64: 32, 64>}, {pipeline_mode = #tpu.pipeline_mode<synchronous>, transform_indices = @transform_2, window_bounds = array<i64: 1, 64>}, {pipeline_mode = #tpu.pipeline_mode<synchronous>, transform_indices = @transform_3, window_bounds = array<i64: 1, 64>}, {pipeline_mode = #tpu.pipeline_mode<synchronous>, transform_indices = @transform_4, window_bounds = array<i64: 1, 64>}, {pipeline_mode = #tpu.pipeline_mode<synchronous>, transform_indices = @transform_5, window_bounds = array<i64: 1, 64>}, {pipeline_mode = #tpu.pipeline_mode<synchronous>, transform_indices = @transform_6, window_bounds = array<i64: 64, 32>}, {pipeline_mode = #tpu.pipeline_mode<synchronous>, transform_indices = @transform_7, window_bounds = array<i64: 1, 32>}, {pipeline_mode = #tpu.pipeline_mode<synchronous>, transform_indices = @transform_8, window_bounds = array<i64: 2, 64, 64>}, {pipeline_mode = #tpu.pipeline_mode<synchronous>, transform_indices = @transform_9, window_bounds = array<i64: 2, 64, 32>}, {pipeline_mode = #tpu.pipeline_mode<synchronous>, transform_indices = @transform_10, window_bounds = array<i64: 32, 32>}, {pipeline_mode = #tpu.pipeline_mode<synchronous>, transform_indices = @transform_11, window_bounds = array<i64: 1, 32>}, {pipeline_mode = #tpu.pipeline_mode<synchronous>, transform_indices = @transform_12, window_bounds = array<i64: 1, 32>}, {pipeline_mode = #tpu.pipeline_mode<synchronous>, transform_indices = @transform_13, window_bounds = array<i64: 1, 1>}, {transform_indices = @transform_14, window_bounds = array<i64: 1, 1, 8>}]} {
    %c0 = arith.constant 0 : index
    %c0_0 = arith.constant 0 : index
    %0 = vector.load %arg1[%c0, %c0_0] : memref<8x4xf32, #tpu.memory_space<vmem>>, vector<8x4xf32>
    %1 = vector.extract_strided_slice %0 {offsets = [0, 3], sizes = [8, 1], strides = [1, 1]} : vector<8x4xf32> to vector<8x1xf32>
    %2 = vector.extract_strided_slice %0 {offsets = [0, 0], sizes = [8, 3], strides = [1, 1]} : vector<8x4xf32> to vector<8x3xf32>
    %3 = arith.fptosi %2 : vector<8x3xf32> to vector<8x3xi32>
    %4 = tpu.iota {dimensions = array<i32: 1>} : vector<8x32xi32>
    %cst = arith.constant 0.000000e+00 : f32
    %5 = vector.broadcast %cst : f32 to vector<8x32xf32>
    %6 = vector.extract_strided_slice %3 {offsets = [0, 0], sizes = [8, 1], strides = [1, 1]} : vector<8x3xi32> to vector<8x1xi32>
    %7 = vector.broadcast %6 : vector<8x1xi32> to vector<8x32xi32>
    %8 = arith.cmpi eq, %7, %4 : vector<8x32xi32>
    %9 = arith.extui %8 : vector<8x32xi1> to vector<8x32xi32>
    %10 = arith.sitofp %9 : vector<8x32xi32> to vector<8x32xf32>
    %11 = arith.addf %5, %10 : vector<8x32xf32>
    %12 = vector.extract_strided_slice %3 {offsets = [0, 1], sizes = [8, 1], strides = [1, 1]} : vector<8x3xi32> to vector<8x1xi32>
    %13 = vector.broadcast %12 : vector<8x1xi32> to vector<8x32xi32>
    %14 = arith.cmpi eq, %13, %4 : vector<8x32xi32>
    %15 = arith.extui %14 : vector<8x32xi1> to vector<8x32xi32>
    %16 = arith.sitofp %15 : vector<8x32xi32> to vector<8x32xf32>
    %17 = arith.addf %11, %16 : vector<8x32xf32>
    %18 = vector.extract_strided_slice %3 {offsets = [0, 2], sizes = [8, 1], strides = [1, 1]} : vector<8x3xi32> to vector<8x1xi32>
    %19 = vector.broadcast %18 : vector<8x1xi32> to vector<8x32xi32>
    %20 = arith.cmpi eq, %19, %4 : vector<8x32xi32>
    %21 = arith.extui %20 : vector<8x32xi1> to vector<8x32xi32>
    %22 = arith.sitofp %21 : vector<8x32xi32> to vector<8x32xf32>
    %23 = arith.addf %17, %22 : vector<8x32xf32>
    %c0_1 = arith.constant 0 : index
    %c0_2 = arith.constant 0 : index
    %24 = vector.load %arg2[%c0_1, %c0_2] : memref<32x64xf32, #tpu.memory_space<vmem>>, vector<32x64xf32>
    %cst_3 = arith.constant dense<0.000000e+00> : vector<8x64xf32>
    %25 = tpu.matmul %23, %24, %cst_3 {dimension_numbers = #tpu.dot_dimension_numbers<[1], [0], [0], [1], [0, 0, 1, 1], [], []>, precision = #tpu.contract_precision<fp32>} : vector<8x32xf32>, vector<32x64xf32>, vector<8x64xf32> -> vector<8x64xf32>
    %c0_4 = arith.constant 0 : index
    %c0_5 = arith.constant 0 : index
    %26 = vector.load %arg3[%c0_4, %c0_5] : memref<1x64xf32, #tpu.memory_space<vmem>>, vector<1x64xf32>
    %27 = vector.broadcast %1 : vector<8x1xf32> to vector<8x64xf32>
    %28 = vector.broadcast %26 : vector<1x64xf32> to vector<8x64xf32>
    %29 = arith.mulf %27, %28 : vector<8x64xf32>
    %30 = arith.addf %25, %29 : vector<8x64xf32>
    %c0_6 = arith.constant 0 : index
    %c0_7 = arith.constant 0 : index
    %31 = vector.load %arg4[%c0_6, %c0_7] : memref<1x64xf32, #tpu.memory_space<vmem>>, vector<1x64xf32>
    %32 = vector.broadcast %31 : vector<1x64xf32> to vector<8x64xf32>
    %33 = arith.addf %30, %32 : vector<8x64xf32>
    %c0_8 = arith.constant 0 : index
    %c0_9 = arith.constant 0 : index
    %34 = vector.load %arg5[%c0_8, %c0_9] : memref<1x64xf32, #tpu.memory_space<vmem>>, vector<1x64xf32>
    %35 = vector.broadcast %1 : vector<8x1xf32> to vector<8x64xf32>
    %36 = vector.broadcast %34 : vector<1x64xf32> to vector<8x64xf32>
    %37 = arith.mulf %35, %36 : vector<8x64xf32>
    %c0_10 = arith.constant 0 : index
    %c0_11 = arith.constant 0 : index
    %38 = vector.load %arg6[%c0_10, %c0_11] : memref<1x64xf32, #tpu.memory_space<vmem>>, vector<1x64xf32>
    %39 = vector.broadcast %38 : vector<1x64xf32> to vector<8x64xf32>
    %40 = arith.addf %37, %39 : vector<8x64xf32>
    %cst_12 = arith.constant 0.000000e+00 : f32
    %41 = vector.broadcast %cst_12 : f32 to vector<8x64xf32>
    %42 = arith.maximumf %40, %41 : vector<8x64xf32>
    %c0_13 = arith.constant 0 : index
    %c0_14 = arith.constant 0 : index
    %43 = vector.load %arg7[%c0_13, %c0_14] : memref<64x32xf32, #tpu.memory_space<vmem>>, vector<64x32xf32>
    %cst_15 = arith.constant dense<0.000000e+00> : vector<8x32xf32>
    %44 = tpu.matmul %42, %43, %cst_15 {dimension_numbers = #tpu.dot_dimension_numbers<[1], [0], [0], [1], [0, 0, 1, 1], [], []>, precision = #tpu.contract_precision<fp32>} : vector<8x64xf32>, vector<64x32xf32>, vector<8x32xf32> -> vector<8x32xf32>
    %c0_16 = arith.constant 0 : index
    %c0_17 = arith.constant 0 : index
    %45 = vector.load %arg8[%c0_16, %c0_17] : memref<1x32xf32, #tpu.memory_space<vmem>>, vector<1x32xf32>
    %46 = vector.broadcast %45 : vector<1x32xf32> to vector<8x32xf32>
    %47 = arith.addf %44, %46 : vector<8x32xf32>
    %cst_18 = arith.constant 0.000000e+00 : f32
    %48 = vector.broadcast %cst_18 : f32 to vector<8x32xf32>
    %49 = arith.maximumf %47, %48 : vector<8x32xf32>
    %c0_19 = arith.constant 0 : index
    %c0_20 = arith.constant 0 : index
    %50 = vector.load %arg11[%c0_19, %c0_20] : memref<32x32xf32, #tpu.memory_space<vmem>>, vector<32x32xf32>
    %cst_21 = arith.constant dense<0.000000e+00> : vector<8x32xf32>
    %51 = tpu.matmul %49, %50, %cst_21 {dimension_numbers = #tpu.dot_dimension_numbers<[1], [0], [0], [1], [0, 0, 1, 1], [], []>, precision = #tpu.contract_precision<fp32>} : vector<8x32xf32>, vector<32x32xf32>, vector<8x32xf32> -> vector<8x32xf32>
    %c0_22 = arith.constant 0 : index
    %c0_23 = arith.constant 0 : index
    %52 = vector.load %arg12[%c0_22, %c0_23] : memref<1x32xf32, #tpu.memory_space<vmem>>, vector<1x32xf32>
    %53 = vector.broadcast %52 : vector<1x32xf32> to vector<8x32xf32>
    %54 = arith.addf %51, %53 : vector<8x32xf32>
    %c0_24 = arith.constant 0 : index
    %c0_25 = arith.constant 0 : index
    %c0_26 = arith.constant 0 : index
    %55 = vector.load %arg9[%c0_24, %c0_25, %c0_26] : memref<2x64x64xf32, #tpu.memory_space<vmem>>, vector<1x64x64xf32>
    %56 = vector.shape_cast %55 : vector<1x64x64xf32> to vector<64x64xf32>
    %cst_27 = arith.constant dense<0.000000e+00> : vector<8x64xf32>
    %57 = tpu.matmul %33, %56, %cst_27 {dimension_numbers = #tpu.dot_dimension_numbers<[1], [0], [0], [1], [0, 0, 1, 1], [], []>, precision = #tpu.contract_precision<fp32>} : vector<8x64xf32>, vector<64x64xf32>, vector<8x64xf32> -> vector<8x64xf32>
    %58 = arith.mulf %33, %57 : vector<8x64xf32>
    %c0_28 = arith.constant 0 : index
    %c0_29 = arith.constant 0 : index
    %c0_30 = arith.constant 0 : index
    %59 = vector.load %arg10[%c0_28, %c0_29, %c0_30] : memref<2x64x32xf32, #tpu.memory_space<vmem>>, vector<1x64x32xf32>
    %60 = vector.shape_cast %59 : vector<1x64x32xf32> to vector<64x32xf32>
    %cst_31 = arith.constant dense<0.000000e+00> : vector<8x32xf32>
    %61 = tpu.matmul %58, %60, %cst_31 {dimension_numbers = #tpu.dot_dimension_numbers<[1], [0], [0], [1], [0, 0, 1, 1], [], []>, precision = #tpu.contract_precision<fp32>} : vector<8x64xf32>, vector<64x32xf32>, vector<8x32xf32> -> vector<8x32xf32>
    %62 = arith.addf %54, %61 : vector<8x32xf32>
    %c1 = arith.constant 1 : index
    %c0_32 = arith.constant 0 : index
    %c0_33 = arith.constant 0 : index
    %63 = vector.load %arg9[%c1, %c0_32, %c0_33] : memref<2x64x64xf32, #tpu.memory_space<vmem>>, vector<1x64x64xf32>
    %64 = vector.shape_cast %63 : vector<1x64x64xf32> to vector<64x64xf32>
    %cst_34 = arith.constant dense<0.000000e+00> : vector<8x64xf32>
    %65 = tpu.matmul %33, %64, %cst_34 {dimension_numbers = #tpu.dot_dimension_numbers<[1], [0], [0], [1], [0, 0, 1, 1], [], []>, precision = #tpu.contract_precision<fp32>} : vector<8x64xf32>, vector<64x64xf32>, vector<8x64xf32> -> vector<8x64xf32>
    %66 = arith.mulf %33, %65 : vector<8x64xf32>
    %c1_35 = arith.constant 1 : index
    %c0_36 = arith.constant 0 : index
    %c0_37 = arith.constant 0 : index
    %67 = vector.load %arg10[%c1_35, %c0_36, %c0_37] : memref<2x64x32xf32, #tpu.memory_space<vmem>>, vector<1x64x32xf32>
    %68 = vector.shape_cast %67 : vector<1x64x32xf32> to vector<64x32xf32>
    %cst_38 = arith.constant dense<0.000000e+00> : vector<8x32xf32>
    %69 = tpu.matmul %66, %68, %cst_38 {dimension_numbers = #tpu.dot_dimension_numbers<[1], [0], [0], [1], [0, 0, 1, 1], [], []>, precision = #tpu.contract_precision<fp32>} : vector<8x64xf32>, vector<64x32xf32>, vector<8x32xf32> -> vector<8x32xf32>
    %70 = arith.addf %62, %69 : vector<8x32xf32>
    %cst_39 = arith.constant 0.000000e+00 : f32
    %71 = vector.broadcast %cst_39 : f32 to vector<8x32xf32>
    %72 = arith.maximumf %70, %71 : vector<8x32xf32>
    %c0_40 = arith.constant 0 : index
    %c0_41 = arith.constant 0 : index
    %73 = vector.load %arg13[%c0_40, %c0_41] : memref<1x32xf32, #tpu.memory_space<vmem>>, vector<1x32xf32>
    %cst_42 = arith.constant dense<0.000000e+00> : vector<1x8xf32>
    %74 = tpu.matmul %73, %72, %cst_42 {dimension_numbers = #tpu.dot_dimension_numbers<[1], [1], [0], [0], [0, 0, 1, 0], [], []>, precision = #tpu.contract_precision<fp32>} : vector<1x32xf32>, vector<8x32xf32>, vector<1x8xf32> -> vector<1x8xf32>
    %c0_43 = arith.constant 0 : index
    %c0_44 = arith.constant 0 : index
    %75 = vector.load %arg14[%c0_43, %c0_44] : memref<1x1xf32, #tpu.memory_space<vmem>>, vector<1x1xf32>
    %76 = vector.broadcast %75 : vector<1x1xf32> to vector<1x8xf32>
    %77 = arith.addf %74, %76 : vector<1x8xf32>
    %c0_45 = arith.constant 0 : index
    %c0_46 = arith.constant 0 : index
    %c0_47 = arith.constant 0 : index
    %78 = vector.load %arg15[%c0_45, %c0_46, %c0_47] : memref<1x1x8xf32, #tpu.memory_space<vmem>>, vector<1x1x8xf32>
    %79 = vector.shape_cast %78 : vector<1x1x8xf32> to vector<1x8xf32>
    %80 = vector.shape_cast %77 : vector<1x8xf32> to vector<1x1x8xf32>
    tpu.vector_store %arg15[%c0_45, %c0_46, %c0_47], %80 {strides = array<i32>} : memref<1x1x8xf32, #tpu.memory_space<vmem>>, vector<1x1x8xf32>,
    return
  }
  func.func @transform_0(%arg0: i32) -> (i32, i32) {
    %c0_i32 = arith.constant 0 : i32
    %c0_i32_0 = arith.constant 0 : i32
    return %arg0, %c0_i32 : i32, i32
  }
  func.func @transform_1(%arg0: i32) -> (i32, i32) {
    %c0_i32 = arith.constant 0 : i32
    %c0_i32_0 = arith.constant 0 : i32
    %c0_i32_1 = arith.constant 0 : i32
    return %c0_i32, %c0_i32_0 : i32, i32
  }
  func.func @transform_2(%arg0: i32) -> (i32, i32) {
    %c0_i32 = arith.constant 0 : i32
    %c0_i32_0 = arith.constant 0 : i32
    %c0_i32_1 = arith.constant 0 : i32
    return %c0_i32, %c0_i32_0 : i32, i32
  }
  func.func @transform_3(%arg0: i32) -> (i32, i32) {
    %c0_i32 = arith.constant 0 : i32
    %c0_i32_0 = arith.constant 0 : i32
    %c0_i32_1 = arith.constant 0 : i32
    return %c0_i32, %c0_i32_0 : i32, i32
  }
  func.func @transform_4(%arg0: i32) -> (i32, i32) {
    %c0_i32 = arith.constant 0 : i32
    %c0_i32_0 = arith.constant 0 : i32
    %c0_i32_1 = arith.constant 0 : i32
    return %c0_i32, %c0_i32_0 : i32, i32
  }
  func.func @transform_5(%arg0: i32) -> (i32, i32) {
    %c0_i32 = arith.constant 0 : i32
    %c0_i32_0 = arith.constant 0 : i32
    %c0_i32_1 = arith.constant 0 : i32
    return %c0_i32, %c0_i32_0 : i32, i32
  }
  func.func @transform_6(%arg0: i32) -> (i32, i32) {
    %c0_i32 = arith.constant 0 : i32
    %c0_i32_0 = arith.constant 0 : i32
    %c0_i32_1 = arith.constant 0 : i32
    return %c0_i32, %c0_i32_0 : i32, i32
  }
  func.func @transform_7(%arg0: i32) -> (i32, i32) {
    %c0_i32 = arith.constant 0 : i32
    %c0_i32_0 = arith.constant 0 : i32
    %c0_i32_1 = arith.constant 0 : i32
    return %c0_i32, %c0_i32_0 : i32, i32
  }
  func.func @transform_8(%arg0: i32) -> (i32, i32, i32) {
    %c0_i32 = arith.constant 0 : i32
    %c0_i32_0 = arith.constant 0 : i32
    %c0_i32_1 = arith.constant 0 : i32
    %c0_i32_2 = arith.constant 0 : i32
    return %c0_i32, %c0_i32_0, %c0_i32_1 : i32, i32, i32
  }
  func.func @transform_9(%arg0: i32) -> (i32, i32, i32) {
    %c0_i32 = arith.constant 0 : i32
    %c0_i32_0 = arith.constant 0 : i32
    %c0_i32_1 = arith.constant 0 : i32
    %c0_i32_2 = arith.constant 0 : i32
    return %c0_i32, %c0_i32_0, %c0_i32_1 : i32, i32, i32
  }
  func.func @transform_10(%arg0: i32) -> (i32, i32) {
    %c0_i32 = arith.constant 0 : i32
    %c0_i32_0 = arith.constant 0 : i32
    %c0_i32_1 = arith.constant 0 : i32
    return %c0_i32, %c0_i32_0 : i32, i32
  }
  func.func @transform_11(%arg0: i32) -> (i32, i32) {
    %c0_i32 = arith.constant 0 : i32
    %c0_i32_0 = arith.constant 0 : i32
    %c0_i32_1 = arith.constant 0 : i32
    return %c0_i32, %c0_i32_0 : i32, i32
  }
  func.func @transform_12(%arg0: i32) -> (i32, i32) {
    %c0_i32 = arith.constant 0 : i32
    %c0_i32_0 = arith.constant 0 : i32
    %c0_i32_1 = arith.constant 0 : i32
    return %c0_i32, %c0_i32_0 : i32, i32
  }
  func.func @transform_13(%arg0: i32) -> (i32, i32) {
    %c0_i32 = arith.constant 0 : i32
    %c0_i32_0 = arith.constant 0 : i32
    %c0_i32_1 = arith.constant 0 : i32
    return %c0_i32, %c0_i32_0 : i32, i32
  }
  func.func @transform_14(%arg0: i32) -> (i32, i32, i32) {
    %c0_i32 = arith.constant 0 : i32
    %c0_i32_0 = arith.constant 0 : i32
    %c0_i32_1 = arith.constant 0 : i32
    return %arg0, %c0_i32, %c0_i32_0 : i32, i32, i32
  }
}

</mosaic_0001>

<bundles_post_ra>
// kernel: tpu_custom_call.1
= control target key start
LH: loop header
LB: loop body
LE: loop exit
PB: predicated region body
PF: predicated region fallthrough
CT: control target
= control target key end

     0   :  { %s7096_s0 = inlined_call_operand.vmem [shape: f32[8,4], index: 0, kind: input, shape index: {}]   ;;  %s7097_s1 = inlined_call_operand.vmem [shape: f32[32,64], index: 1, kind: input, shape index: {}]   ;;  %s7098_s2 = inlined_call_operand.vmem [shape: f32[1,64], index: 2, kind: input, shape index: {}]   ;;  %s7099_s3 = inlined_call_operand.vmem [shape: f32[1,64], index: 3, kind: input, shape index: {}]   ;;  %s7100_s4 = inlined_call_operand.vmem [shape: f32[1,64], index: 4, kind: input, shape index: {}]   ;;  %s7101_s5 = inlined_call_operand.vmem [shape: f32[1,64], index: 5, kind: input, shape index: {}]   ;;  %s7102_s6 = inlined_call_operand.vmem [shape: f32[64,32], index: 6, kind: input, shape index: {}]   ;;  %s7103_s7 = inlined_call_operand.vmem [shape: f32[1,32], index: 7, kind: input, shape index: {}]   ;;  %s7104_s8 = inlined_call_operand.vmem [shape: f32[2,64,64], index: 8, kind: input, shape index: {}]   ;;  %s7105_s9 = inlined_call_operand.vmem [shape: f32[2,64,32], index: 9, kind: input, shape index: {}]   ;;  %s7106_s10 = inlined_call_operand.vmem [shape: f32[32,32], index: 10, kind: input, shape index: {}]   ;;  %s7107_s11 = inlined_call_operand.vmem [shape: f32[1,32], index: 11, kind: input, shape index: {}]   ;;  %s7108_s12 = inlined_call_operand.vmem [shape: f32[1,32], index: 12, kind: input, shape index: {}]   ;;  %s7109_s13 = inlined_call_operand.<no memory space> [shape: f32[1,1], index: 13, kind: input, shape index: {}]   ;;  %s7110_s14 = inlined_call_operand.hbm [shape: f32[1,1,8], index: 14, kind: output, shape index: {}]  }
   0x1   :  { %v19_v0 = vstv %s7109_s13 }
   0x2   :  { %20 = vst [vmem:[#allocation2] sm:$0x1] %v19_v0 }
   0x3   :  { %v50_v1 = vld [vmem:[%s7096_s0] sm:$0xff]  ;;  %v5984_v2 = vmov 0   ;;  %v5985_v4 = vmov 2  }
   0x4   :  { %5954 = vset.pattern.permute.xlu0 %v5984_v2  ;;  %v5944_v3 = vtrunc.f32 %v50_v1  ;;  %5956 = vset.pattern.permute.xlu1 %v5985_v4 }
   0x5   :  { %21 = vsyncpa [#allocation4], 0  ;;  %v5986_v6 = vmov 1   ;;  %v5987_v7 = vmov 3   ;;  %v75_v8 = vld [vmem:[%s7097_s1] sm:$0xff]  ;;  %v76_v9 = vld [vmem:[%s7097_s1 + $0x8] sm:$0xff]  ;;  %v7111_v42 = vlaneseq }
   0x6   :  { %v5945_v5 = vcvt.f32.s32 %v5944_v3  ;;  %v97_v10 = vand.u32 4294901760, %v75_v8  ;;  %v100_v11 = vand.u32 4294901760, %v76_v9  ;;  %v5988_v13 = vmov 0.0|0.0   ;;  %v77_v14 = vld [vmem:[%s7097_s1 + $0x10] sm:$0xff]  ;;  %v78_v15 = vld [vmem:[%s7097_s1 + $0x18] sm:$0xff]  ;;  %v606_v63 = vld [vmem:[%s7102_s6] sm:$0xff] }
   0x7   :  { %5454 = vmatprep.subr.bf16.mxu1 %v5988_v13  ;;  %5436 = vmatprep.subr.bf16.mxu0 %v5988_v13  ;;  %v103_v16 = vand.u32 4294901760, %v77_v14  ;;  %v106_v17 = vand.u32 4294901760, %v78_v15  ;;  %vm5989_vm0 = vmmov 0   ;;  %v5990_v23 = vmov 0.0   ;;  %v4342_v58 = vld [vmem:[%s7100_s4] ss:$0 sm:$0xff] }
   0x8   :  { %55 = vperm.xlu0 %5954, %v5945_v5   ;;  %69 = vperm.xlu1 %5956, %v5945_v5   ;;  %v6079_v12 = vpack.c.bf16 %v100_v11, %v97_v10  ;;  %v6093_v18 = vsub.f32 %v75_v8, %v97_v10  ;;  %v6095_v19 = vsub.f32 %v76_v9, %v100_v11  ;;  %v53_v43 = vand.u32 127, %v7111_v42  ;;  %v4343_v61 = vld [vmem:[%s7101_s5] ss:$0 sm:$0xff]  ;;  %v607_v0 = vld [vmem:[%s7102_s6 + $0x8] sm:$0xff]  ;;  %v608_v4 = vld [vmem:[%s7102_s6 + $0x10] sm:$0xff] }
   0x9   :  { %v5440_v20 = vpack.c.bf16 %v106_v17, %v103_v16  ;;  %v6097_v21 = vsub.f32 %v77_v14, %v103_v16  ;;  %v6099_v22 = vsub.f32 %v78_v15, %v106_v17  ;;  %4745 = vmatprep.mubr.msk.f32.mxu1 %vm5989_vm0, %v5990_v23  ;;  %4712 = vmatprep.mubr.msk.f32.mxu0 %vm5989_vm0, %v5990_v23  ;;  %vm92_vm4 = vcmask 261120   ;;  %v610_v14 = vld [vmem:[%s7102_s6 + $0x20] sm:$0xff]  ;;  %v611_v15 = vld [vmem:[%s7102_s6 + $0x28] sm:$0xff] }
   0xa   :  { %5456 = vmatpush3.bf16.msra.mxu1 %v6079_v12  ;;  %5438 = vmatpush3.bf16.msra.mxu0 %v6079_v12  ;;  %v178_v24 = vand.u32 4294901760, %v6093_v18  ;;  %v185_v25 = vand.u32 4294901760, %v6095_v19  ;;  %v5449_v38 = vpack.c.bf16 %v6095_v19, %v6093_v18  ;;  %vm621_vm5 = vcmask 523264  }
   0xb   :  { %5457 = vmatprep.subr.bf16.mxu1 %v5988_v13  ;;  %5439 = vmatprep.subr.bf16.mxu0 %v5988_v13  ;;  %v192_v30 = vand.u32 4294901760, %v6097_v21  ;;  %v199_v31 = vand.u32 4294901760, %v6099_v22  ;;  %v5452_v39 = vpack.c.bf16 %v6099_v22, %v6097_v21  ;;  %v629_v3 = vand.u32 4294901760, %v607_v0 }
   0xc   :  { %5955 = vset.pattern.permute.xlu0 %v5986_v6  ;;  %5957 = vset.pattern.permute.xlu1 %v5987_v7  ;;  %v179_v26 = vsub.f32 %v6093_v18, %v178_v24  ;;  %v186_v27 = vsub.f32 %v6095_v19, %v185_v25  ;;  %v5461_v40 = vpack.c.bf16 %v185_v25, %v178_v24  ;;  %v632_v10 = vand.u32 4294901760, %v608_v4  ;;  %v612_v18 = vld [vmem:[%s7102_s6 + $0x30] sm:$0xff]  ;;  %v613_v19 = vld [vmem:[%s7102_s6 + $0x38] sm:$0xff] }
   0xd   :  { %62 = vperm.xlu0 %5955, %v5945_v5   ;;  %82 = vperm.xlu1 %5957, %v50_v1   ;;  %v193_v33 = vsub.f32 %v6097_v21, %v192_v30  ;;  %v200_v34 = vsub.f32 %v6099_v22, %v199_v31  ;;  %v5464_v41 = vpack.c.bf16 %v199_v31, %v192_v30  ;;  %v609_v5 = vld [vmem:[%s7102_s6 + $0x18] sm:$0xff]  ;;  %v638_v24 = vand.u32 4294901760, %v610_v14 }
   0xe   :  { %5459 = vmatpush3.bf16.msra.mxu1 %v5440_v20  ;;  %5441 = vmatpush3.bf16.msra.mxu0 %v5440_v20  ;;  %v180_v28 = vand.u32 4294901760, %v179_v26  ;;  %v187_v29 = vand.u32 4294901760, %v186_v27  ;;  %v6166_v8 = vsub.f32 %v607_v0, %v629_v3  ;;  %v635_v11 = vand.u32 4294901760, %v609_v5 }
   0xf   :  { %5466 = vmatprep.subr.bf16.mxu1 %v5988_v13  ;;  %5442 = vmatprep.subr.bf16.mxu0 %v5988_v13  ;;  %v194_v35 = vand.u32 4294901760, %v193_v33  ;;  %v201_v36 = vand.u32 4294901760, %v200_v34  ;;  %v6179_v16 = vsub.f32 %v608_v4, %v632_v10  ;;  %v641_v25 = vand.u32 4294901760, %v611_v15 }
  0x10   :  { %v5443_v32 = vpack.c.bf16 %v187_v29, %v180_v28  ;;  %v6181_v17 = vsub.f32 %v609_v5, %v635_v11  ;;  %v718_v21 = vand.u32 4294901760, %v6166_v8  ;;  %v6192_v22 = vpack.c.bf16 %v635_v11, %v632_v10  ;;  %v1662_v11 = vld [vmem:[%s7104_s8] sm:$0xff] }
  0x11   :  { %5958 = vset.pattern.permute.xlu1 %v5984_v2  ;;  %5959 = vset.pattern.permute.xlu0 %v5984_v2  ;;  %v5446_v37 = vpack.c.bf16 %v201_v36, %v194_v35  ;;  %v626_v2 = vand.u32 4294901760, %v606_v63  ;;  %v644_v27 = vand.u32 4294901760, %v612_v18  ;;  %v647_v28 = vand.u32 4294901760, %v613_v19 }
  0x12   :  { %v719_v30 = vsub.f32 %v6166_v8, %v718_v21  ;;  %v725_v31 = vand.u32 4294901760, %v6179_v16  ;;  %v6209_v33 = vpack.c.bf16 %v641_v25, %v638_v24  ;;  %v6211_v34 = vsub.f32 %v610_v14, %v638_v24  ;;  %v1663_v14 = vld [vmem:[%s7104_s8 + $0x8] sm:$0xff] }
  0x13   :  { %v6164_v7 = vsub.f32 %v606_v63, %v626_v2  ;;  %v6168_v9 = vpack.c.bf16 %v629_v3, %v626_v2  ;;  %v6213_v35 = vsub.f32 %v611_v15, %v641_v25  ;;  %v5500_v3 = vpack.c.bf16 %v6181_v17, %v6179_v16  ;;  %v1665_v15 = vld [vmem:[%s7104_s8 + $0x18] sm:$0xff] }
  0x14   :  { %vm4321_vm6 = vcmask 57344  }
  0x15   :  { %v5497_v2 = vpack.c.bf16 %v6166_v8, %v6164_v7  ;;  %v5503_v4 = vpack.c.bf16 %v6213_v35, %v6211_v34 }
  0x87   :  { %v56_v44 = vpop.permute.xlu0 %55  ;;  %v70_v45 = vpop.permute.xlu1 %69 }
  0x88   :  { %vm57_vm1 = vcmp.eq.s32.totalorder %v56_v44, %v53_v43  ;;  %vm71_vm2 = vcmp.eq.s32.totalorder %v70_v45, %v53_v43  ;;  %v6228_v44 = vsub.f32 %v613_v19, %v647_v28  ;;  %v739_v45 = vand.u32 4294901760, %v6211_v34  ;;  %v1667_v19 = vld [vmem:[%s7104_s8 + $0x28] sm:$0xff] }
  0x89   :  { %v4337_v47 = vsel %vm57_vm1, 1.0, %v5990_v23  ;;  %v4339_v49 = vsel %vm71_vm2, 1.0, %v5990_v23 }
  0x8c   :  { %v63_v46 = vpop.permute.xlu0 %62  ;;  %v6135_v59 = vpop.permute.xlu1 %82 }
  0x8d   :  { %vm64_vm3 = vcmp.eq.s32.totalorder %v63_v46, %v53_v43  ;;  %v596_v60 = vmul.f32 %v4342_v58, %v6135_v59  ;;  %v6226_v43 = vsub.f32 %v612_v18, %v644_v27  ;;  %v746_v46 = vand.u32 4294901760, %v6213_v35  ;;  %v1666_v18 = vld [vmem:[%s7104_s8 + $0x20] sm:$0xff] }
  0x8e   :  { %v4338_v48 = vsel %vm64_vm3, 1.0, %v5990_v23  ;;  %v1686_v25 = vand.u32 4294901760, %v1666_v18 }
  0x8f   :  { %v67_v50 = vadd.f32 %v4338_v48, %v4337_v47  ;;  %v604_v62 = vadd.f32 %v4343_v61, %v596_v60  ;;  %v5506_v5 = vpack.c.bf16 %v6228_v44, %v6226_v43 }
  0x91   :  { %v74_v51 = vadd.f32 %v4339_v49, %v67_v50  ;;  %v605_v1 = vmax.f32 %v604_v62, 0.0 }
  0x93   :  { %v94_v52 = vsel %vm92_vm4, %v74_v51, 0  ;;  %v623_v6 = vsel %vm621_vm5, %v605_v1, 0  ;;  %v740_v51 = vsub.f32 %v6211_v34, %v739_v45 }
  0x94   :  { %v165_v53 = vand.u32 4294901760, %v94_v52 }
  0x96   :  { %v166_v54 = vsub.f32 %v94_v52, %v165_v53  ;;  %v747_v52 = vsub.f32 %v6213_v35, %v746_v46 }
  0x98   :  { %v167_v55 = vand.u32 4294901760, %v166_v54  ;;  %v748_v58 = vand.u32 4294901760, %v747_v52 }
  0x9a   :  { %4746 = vmatmul.mubr.f32.vlgmr.msra.gmra.mrb[0].mxu1 %v167_v55  ;;  %v168_v56 = vsub.f32 %v166_v54, %v167_v55 }
  0x9b   :  { %5468 = vmatpush3.bf16.msra.mxu1 %v6079_v12  ;;  %4767 = vmatprep.mubr.msk.f32.mxu1 %vm5989_vm0, %v5990_v23  ;;  %v6170_v12 = vand.u32 4294901760, %v623_v6 }
  0x9c   :  { %5469 = vmatprep.subr.bf16.mxu1 %v5988_v13  ;;  %v169_v57 = vand.u32 4294901760, %v168_v56 }
  0x9d   :  { %v6197_v26 = vsub.f32 %v623_v6, %v6170_v12 }
  0x9e   :  { %4713 = vmatmul.mubr.f32.vlgmr.msra.gmra.mrb[0].mxu0 %v169_v57  ;;  %v741_v57 = vand.u32 4294901760, %v740_v51 }
  0x9f   :  { %5444 = vmatpush3.bf16.msra.mxu0 %v5443_v32  ;;  %5471 = vmatpush3.bf16.msra.mxu1 %v5440_v20  ;;  %v711_v20 = vand.u32 4294901760, %v6164_v7  ;;  %v732_v32 = vand.u32 4294901760, %v6181_v17  ;;  %v700_v36 = vand.u32 4294901760, %v6197_v26 }
  0xa0   :  { %5445 = vmatprep.subr.bf16.mxu0 %v5988_v13  ;;  %4723 = vmatprep.mubr.msk.f32.mxu0 %vm5989_vm0, %v5990_v23  ;;  %v5491_v62 = vpack.c.bf16 %v748_v58, %v741_v57 }
  0xa1   :  { %5544 = vmatprep.subr.bf16.mxu1 %v5988_v13  ;;  %v712_v29 = vsub.f32 %v6164_v7, %v711_v20  ;;  %v701_v47 = vsub.f32 %v6197_v26, %v700_v36  ;;  %v5521_v6 = vpack.c.bf16 %v718_v21, %v711_v20  ;;  %v5524_v10 = vpack.c.bf16 %v732_v32, %v725_v31 }
  0xa2   :  { %4768 = vmatmul.mubr.f32.vlgmr.msra.gmra.mrb[2].mxu1 %v165_v53  ;;  %v5527_v7 = vpack.c.bf16 %v746_v46, %v739_v45  ;;  %v1683_v21 = vand.u32 4294901760, %v1665_v15 }
  0xa3   :  { %5447 = vmatpush3.bf16.msra.mxu0 %v5446_v37  ;;  %4892 = vmatprep.mubr.msk.f32.mxu1 %vm5989_vm0, %v5990_v23  ;;  %v6217_v37 = vpack.c.bf16 %v647_v28, %v644_v27  ;;  %v702_v55 = vand.u32 4294901760, %v701_v47  ;;  %v1668_v28 = vld [vmem:[%s7104_s8 + $0x30] sm:$0xff] }
  0xa4   :  { %5448 = vmatprep.subr.bf16.mxu0 %v5988_v13  ;;  %v1692_v34 = vand.u32 4294901760, %v1668_v28 }
  0xa6   :  { %4724 = vmatmul.mubr.f32.vlgmr.msra.gmra.mrb[2].mxu0 %v165_v53 }
  0xa7   :  { %5450 = vmatpush3.bf16.msra.mxu0 %v5449_v38  ;;  %4734 = vmatprep.mubr.msk.f32.mxu0 %vm5989_vm0, %v5990_v23  ;;  %v713_v38 = vand.u32 4294901760, %v712_v29  ;;  %v1669_v29 = vld [vmem:[%s7104_s8 + $0x38] sm:$0xff] }
  0xa8   :  { %5451 = vmatprep.subr.bf16.mxu0 %v5988_v13  ;;  %v1695_v35 = vand.u32 4294901760, %v1669_v29 }
  0xaa   :  { %v6393_v58 = vpack.c.bf16 %v1695_v35, %v1692_v34 }
  0xab   :  { %5453 = vmatpush3.bf16.msra.mxu0 %v5452_v39  ;;  %v720_v39 = vand.u32 4294901760, %v719_v30 }
  0xac   :  { %5460 = vmatprep.subr.bf16.mxu0 %v5988_v13 }
  0xad   :  { %v5485_v48 = vpack.c.bf16 %v720_v39, %v713_v38  ;;  %v6352_v39 = vsub.f32 %v1668_v28, %v1692_v34 }
  0xae   :  { %4735 = vmatmul.mubr.f32.vlgmr.msra.gmra.mrb[4].mxu0 %v166_v54  ;;  %v760_v54 = vand.u32 4294901760, %v6228_v44 }
  0xaf   :  { %5462 = vmatpush3.bf16.msra.mxu0 %v5461_v40  ;;  %4756 = vmatprep.mubr.msk.f32.mxu0 %vm5989_vm0, %v5990_v23  ;;  %v726_v40 = vsub.f32 %v6179_v16, %v725_v31  ;;  %v1674_v16 = vand.u32 4294901760, %v1662_v11  ;;  %v6342_v31 = vsub.f32 %v1665_v15, %v1683_v21 }
  0xb0   :  { %5463 = vmatprep.subr.bf16.mxu0 %v5988_v13  ;;  %v761_v61 = vsub.f32 %v6228_v44, %v760_v54 }
  0xb1   :  { %v727_v49 = vand.u32 4294901760, %v726_v40  ;;  %v7116_v45 = vand.u32 4294901760, %v6342_v31 }
  0xb2   :  { %v762_v0 = vand.u32 4294901760, %v761_v61 }
  0xb3   :  { %5465 = vmatpush3.bf16.msra.mxu0 %v5464_v41  ;;  %v733_v41 = vsub.f32 %v6181_v17, %v732_v32  ;;  %v1677_v17 = vand.u32 4294901760, %v1663_v14  ;;  %v6344_v32 = vsub.f32 %v1666_v18, %v1686_v25 }
  0xb4   :  { %5472 = vmatprep.subr.bf16.mxu0 %v5988_v13 }
  0xb5   :  { %v734_v50 = vand.u32 4294901760, %v733_v41  ;;  %v6329_v24 = vsub.f32 %v1663_v14, %v1677_v17  ;;  %v6331_v27 = vpack.c.bf16 %v1677_v17, %v1674_v16  ;;  %v1163_v14 = vld [vmem:[%s7106_s10] sm:$0xff] }
  0xb6   :  { %4757 = vmatmul.mubr.f32.vlgmr.msra.gmra.mrb[6].mxu0 %v165_v53  ;;  %v753_v53 = vand.u32 4294901760, %v6226_v43 }
  0xb7   :  { %5474 = vmatpush3.bf16.msra.mxu0 %v6168_v9  ;;  %4786 = vmatprep.mubr.msk.f32.mxu0 %vm5989_vm0, %v5990_v23  ;;  %v5488_v56 = vpack.c.bf16 %v734_v50, %v727_v49  ;;  %v1766_v38 = vand.u32 4294901760, %v6329_v24 }
  0xb8   :  { %5475 = vmatprep.subr.bf16.mxu0 %v5988_v13  ;;  %v754_v60 = vsub.f32 %v6226_v43, %v753_v53  ;;  %v5530_v8 = vpack.c.bf16 %v760_v54, %v753_v53  ;;  %v7115_v53 = vand.u32 4294901760, %v6344_v32 }
  0xb9   :  { %v1767_v43 = vsub.f32 %v6329_v24, %v1766_v38 }
  0xba   :  { %v755_v63 = vand.u32 4294901760, %v754_v60 }
  0xbb   :  { %5477 = vmatpush3.bf16.msra.mxu0 %v6192_v22  ;;  %v1768_v46 = vand.u32 4294901760, %v1767_v43 }
  0xbc   :  { %5478 = vmatprep.subr.bf16.mxu0 %v5988_v13  ;;  %v5494_v1 = vpack.c.bf16 %v762_v0, %v755_v63 }
  0xbf   :  { %5480 = vmatpush3.bf16.msra.mxu0 %v6209_v33 }
  0xc0   :  { %5481 = vmatprep.subr.bf16.mxu0 %v5988_v13 }
  0xc3   :  { %5483 = vmatpush3.bf16.msra.mxu0 %v6217_v37 }
  0xc4   :  { %5484 = vmatprep.subr.bf16.mxu0 %v5988_v13 }
  0xc6   :  { %4787 = vmatmul.mubr.f32.vlgmr.msra.gmra.mrb[8].mxu0 %v702_v55 }
  0xc7   :  { %5486 = vmatpush3.bf16.msra.mxu0 %v5485_v48  ;;  %4805 = vmatprep.mubr.msk.f32.mxu0 %vm5989_vm0, %v5990_v23  ;;  %v1781_v48 = vsub.f32 %v6342_v31, %v7116_v45 }
  0xc8   :  { %5487 = vmatprep.subr.bf16.mxu0 %v5988_v13 }
  0xc9   :  { %v1782_v52 = vand.u32 4294901760, %v1781_v48 }
  0xcb   :  { %5489 = vmatpush3.bf16.msra.mxu0 %v5488_v56  ;;  %v1788_v56 = vsub.f32 %v6344_v32, %v7115_v53 }
  0xcc   :  { %5490 = vmatprep.subr.bf16.mxu0 %v5988_v13 }
  0xcd   :  { %v1789_v60 = vand.u32 4294901760, %v1788_v56 }
  0xcf   :  { %5492 = vmatpush3.bf16.msra.mxu0 %v5491_v62  ;;  %v7113_v62 = vand.u32 4294901760, %v6352_v39 }
  0xd0   :  { %5493 = vmatprep.subr.bf16.mxu0 %v5988_v13 }
  0xd3   :  { %5495 = vmatpush3.bf16.msra.mxu0 %v5494_v1  ;;  %v1802_v1 = vsub.f32 %v6352_v39, %v7113_v62 }
  0xd4   :  { %5496 = vmatprep.subr.bf16.mxu0 %v5988_v13 }
  0xd6   :  { %4806 = vmatmul.mubr.f32.vlgmr.msra.gmra.mrb[8].mxu0 %v6170_v12 }
  0xd7   :  { %5498 = vmatpush3.bf16.msra.mxu0 %v5497_v2  ;;  %4824 = vmatprep.mubr.msk.f32.mxu0 %vm5989_vm0, %v5990_v23 }
  0xd8   :  { %5499 = vmatprep.subr.bf16.mxu0 %v5988_v13 }
  0xdb   :  { %5501 = vmatpush3.bf16.msra.mxu0 %v5500_v3  ;;  %v1803_v3 = vand.u32 4294901760, %v1802_v1 }
  0xdc   :  { %5502 = vmatprep.subr.bf16.mxu0 %v5988_v13 }
  0xdf   :  { %5504 = vmatpush3.bf16.msra.mxu0 %v5503_v4 }
  0xe0   :  { %5505 = vmatprep.subr.bf16.mxu0 %v5988_v13 }
  0xe3   :  { %5507 = vmatpush3.bf16.msra.mxu0 %v5506_v5 }
  0xe4   :  { %5508 = vmatprep.subr.bf16.mxu0 %v5988_v13 }
  0xe6   :  { %4825 = vmatmul.mubr.f32.vlgmr.msra.gmra.mrb[8].mxu0 %v6197_v26  ;;  %v1689_v26 = vand.u32 4294901760, %v1667_v19 }
  0xe7   :  { %5510 = vmatpush3.bf16.msra.mxu0 %v6168_v9  ;;  %4843 = vmatprep.mubr.msk.f32.mxu0 %vm5989_vm0, %v5990_v23 }
  0xe8   :  { %5511 = vmatprep.subr.bf16.mxu0 %v5988_v13  ;;  %v6377_v49 = vpack.c.bf16 %v1689_v26, %v1686_v25  ;;  %v1165_v25 = vld [vmem:[%s7106_s10 + $0x10] sm:$0xff] }
  0xeb   :  { %5513 = vmatpush3.bf16.msra.mxu0 %v6192_v22 }
  0xec   :  { %5514 = vmatprep.subr.bf16.mxu0 %v5988_v13 }
  0xef   :  { %5516 = vmatpush3.bf16.msra.mxu0 %v6209_v33 }
  0xf0   :  { %5517 = vmatprep.subr.bf16.mxu0 %v5988_v13 }
  0xf3   :  { %5519 = vmatpush3.bf16.msra.mxu0 %v6217_v37 }
  0xf4   :  { %5520 = vmatprep.subr.bf16.mxu0 %v5988_v13 }
  0xf6   :  { %4844 = vmatmul.mubr.f32.vlgmr.msra.gmra.mrb[8].mxu0 %v700_v36 }
  0xf7   :  { %5522 = vmatpush3.bf16.msra.mxu0 %v5521_v6  ;;  %4862 = vmatprep.mubr.msk.f32.mxu0 %vm5989_vm0, %v5990_v23 }
  0xf8   :  { %5523 = vmatprep.subr.bf16.mxu0 %v5988_v13 }
  0xfb   :  { %5525 = vmatpush3.bf16.msra.mxu0 %v5524_v10 }
  0xfc   :  { %5526 = vmatprep.subr.bf16.mxu0 %v5988_v13 }
  0xff   :  { %5528 = vmatpush3.bf16.msra.mxu0 %v5527_v7 }
 0x100   :  { %5529 = vmatprep.subr.bf16.mxu0 %v5988_v13 }
 0x103   :  { %5531 = vmatpush3.bf16.msra.mxu0 %v5530_v8 }
 0x104   :  { %5532 = vmatprep.subr.bf16.mxu0 %v5988_v13 }
 0x106   :  { %4863 = vmatmul.mubr.f32.vlgmr.msra.gmra.mrb[8].mxu0 %v6170_v12 }
 0x107   :  { %5534 = vmatpush3.bf16.msra.mxu0 %v6168_v9  ;;  %4881 = vmatprep.mubr.msk.f32.mxu0 %vm5989_vm0, %v5990_v23  ;;  %v1664_v9 = vld [vmem:[%s7104_s8 + $0x10] sm:$0xff] }
 0x108   :  { %5535 = vmatprep.subr.bf16.mxu0 %v5988_v13  ;;  %v1680_v20 = vand.u32 4294901760, %v1664_v9 }
 0x10a   :  { %v6340_v30 = vsub.f32 %v1664_v9, %v1680_v20  ;;  %v6360_v41 = vpack.c.bf16 %v1683_v21, %v1680_v20  ;;  %v1164_v9 = vld [vmem:[%s7106_s10 + $0x8] sm:$0xff] }
 0x10b   :  { %5537 = vmatpush3.bf16.msra.mxu0 %v6192_v22  ;;  %v6327_v22 = vsub.f32 %v1662_v11, %v1674_v16  ;;  %v1178_v16 = vand.u32 4294901760, %v1163_v14  ;;  %v1181_v17 = vand.u32 4294901760, %v1164_v9 }
 0x10c   :  { %5538 = vmatprep.subr.bf16.mxu0 %v5988_v13  ;;  %v7117_v44 = vand.u32 4294901760, %v6340_v30  ;;  %v5608_v10 = vpack.c.bf16 %v6342_v31, %v6340_v30 }
 0x10d   :  { %v1759_v36 = vand.u32 4294901760, %v6327_v22  ;;  %v5605_v6 = vpack.c.bf16 %v6329_v24, %v6327_v22  ;;  %v6424_v18 = vpack.c.bf16 %v1181_v17, %v1178_v16  ;;  %v6428_v20 = vsub.f32 %v1164_v9, %v1181_v17 }
 0x10e   :  { %v1774_v47 = vsub.f32 %v6340_v30, %v7117_v44 }
 0x10f   :  { %5540 = vmatpush3.bf16.msra.mxu0 %v6209_v33  ;;  %v6346_v33 = vsub.f32 %v1667_v19, %v1689_v26  ;;  %v1760_v40 = vsub.f32 %v6327_v22, %v1759_v36  ;;  %v6426_v19 = vsub.f32 %v1163_v14, %v1178_v16  ;;  %v1166_v26 = vld [vmem:[%s7106_s10 + $0x18] sm:$0xff]  ;;  %5546 = vmatpush3.bf16.msra.mxu1 %v6424_v18  ;;  %v1266_v43 = vand.u32 4294901760, %v6428_v20 }
 0x110   :  { %5541 = vmatprep.subr.bf16.mxu0 %v5988_v13  ;;  %v1775_v51 = vand.u32 4294901760, %v1774_v47  ;;  %v1187_v34 = vand.u32 4294901760, %v1166_v26  ;;  %5547 = vmatprep.subr.bf16.mxu1 %v5988_v13  ;;  %v7120_v22 = vand.u32 4294901760, %v6344_v32 }
 0x111   :  { %v7114_v54 = vand.u32 4294901760, %v6346_v33  ;;  %v5611_v7 = vpack.c.bf16 %v6346_v33, %v6344_v32  ;;  %v7121_v24 = vand.u32 4294901760, %v6346_v33 }
 0x112   :  { %v6384_v55 = vpack.c.bf16 %v1782_v52, %v1775_v51  ;;  %v6447_v47 = vsub.f32 %v1166_v26, %v1187_v34  ;;  %v1267_v52 = vsub.f32 %v6428_v20, %v1266_v43 }
 0x113   :  { %5543 = vmatpush3.bf16.msra.mxu0 %v6217_v37  ;;  %v6354_v37 = vsub.f32 %v1669_v29, %v1695_v35  ;;  %v1795_v57 = vsub.f32 %v6346_v33, %v7114_v54  ;;  %v1184_v29 = vand.u32 4294901760, %v1165_v25  ;;  %v1259_v35 = vand.u32 4294901760, %v6426_v19  ;;  %v2211_v33 = vld [vmem:[%s7105_s9] sm:$0xff] }
 0x114   :  { %5580 = vmatprep.subr.bf16.mxu0 %v5988_v13  ;;  %v1280_v1 = vand.u32 4294901760, %v6447_v47 }
 0x115   :  { %v1796_v61 = vand.u32 4294901760, %v1795_v57  ;;  %v7112_v63 = vand.u32 4294901760, %v6354_v37  ;;  %v5614_v8 = vpack.c.bf16 %v6354_v37, %v6352_v39  ;;  %v1260_v48 = vsub.f32 %v6426_v19, %v1259_v35 }
 0x116   :  { %4882 = vmatmul.mubr.f32.vlgmr.msra.gmra.mrb[8].mxu0 %v6170_v12  ;;  %v1761_v12 = vand.u32 4294901760, %v1760_v40  ;;  %v4340_v40 = vld [vmem:[%s7098_s2] ss:$0 sm:$0xff]  ;;  %v1281_v14 = vsub.f32 %v6447_v47, %v1280_v1 }
 0x117   :  { %5582 = vmatpush3.bf16.msra.mxu0 %v6331_v27  ;;  %4966 = vmatprep.mubr.msk.f32.mxu0 %vm5989_vm0, %v5990_v23  ;;  %v6398_v0 = vpack.c.bf16 %v1796_v61, %v1789_v60  ;;  %v1809_v2 = vsub.f32 %v6354_v37, %v7112_v63  ;;  %v91_v56 = vmul.f32 %v4340_v40, %v6135_v59  ;;  %v1261_v60 = vand.u32 4294901760, %v1260_v48 }
 0x118   :  { %5583 = vmatprep.subr.bf16.mxu0 %v5988_v13  ;;  %v6379_v50 = vpack.c.bf16 %v1768_v46, %v1761_v12  ;;  %v6443_v12 = vpack.c.bf16 %v1187_v34, %v1184_v29  ;;  %v6445_v46 = vsub.f32 %v1165_v25, %v1184_v29  ;;  %v1282_v25 = vand.u32 4294901760, %v1281_v14 }
 0x119   :  { %v1810_v4 = vand.u32 4294901760, %v1809_v2  ;;  %v1268_v2 = vand.u32 4294901760, %v1267_v52  ;;  %v6473_v14 = vpack.c.bf16 %v1266_v43, %v1259_v35 }
 0x11a   :  { %5549 = vmatpush3.bf16.msra.mxu1 %v6443_v12  ;;  %v1273_v61 = vand.u32 4294901760, %v6445_v46  ;;  %v5560_v48 = vpack.c.bf16 %v6447_v47, %v6445_v46 }
 0x11b   :  { %5585 = vmatpush3.bf16.msra.mxu0 %v6360_v41  ;;  %v6408_v5 = vpack.c.bf16 %v1810_v4, %v1803_v3  ;;  %5550 = vmatprep.subr.bf16.mxu1 %v5988_v13 }
 0x11c   :  { %5586 = vmatprep.subr.bf16.mxu0 %v5988_v13  ;;  %v1274_v4 = vsub.f32 %v6445_v46, %v1273_v61  ;;  %v2214_v46 = vld [vmem:[%s7105_s9 + $0x18] sm:$0xff] }
 0x11e   :  { %v1275_v17 = vand.u32 4294901760, %v1274_v4 }
 0x11f   :  { %5588 = vmatpush3.bf16.msra.mxu0 %v6377_v49 }
 0x120   :  { %5589 = vmatprep.subr.bf16.mxu0 %v5988_v13  ;;  %v6460_v26 = vpack.c.bf16 %v1282_v25, %v1275_v17  ;;  %v4350_v25 = vld [vmem:[%s7104_s8 + $0x60] sm:$0xff] }
 0x123   :  { %5591 = vmatpush3.bf16.msra.mxu0 %v6393_v58 }
 0x124   :  { %5592 = vmatprep.subr.bf16.mxu0 %v5988_v13 }
 0x16d   :  { %v419_v11 = vpop.f32.mrb[0].mxu1 }
 0x16e   :  { %v4747_v15 = vpop.f32.mrb[1].mxu1 }
 0x16f   :  { %v6458_v15 = vpack.c.bf16 %v1268_v2, %v1261_v60  ;;  %v4341_v60 = vld [vmem:[%s7099_s3] ss:$0 sm:$0xff] }
 0x171   :  { %v171_v21 = vpop.f32.mrb[0].mxu0 }
 0x172   :  { %v4714_v28 = vpop.f32.mrb[1].mxu0  ;;  %v172_v3 = vadd.f32 %v171_v21, %v91_v56 }
 0x173   :  { %v5557_v28 = vpack.c.bf16 %v6428_v20, %v6426_v19  ;;  %v7118_v19 = vand.u32 4294901760, %v6340_v30  ;;  %v7119_v20 = vand.u32 4294901760, %v6342_v31  ;;  %v7123_v30 = vand.u32 4294901760, %v6354_v37 }
 0x174   :  { %v2223_v37 = vand.u32 4294901760, %v2211_v33 }
 0x175   :  { %v577_v51 = vpop.f32.mrb[2].mxu1 }
 0x176   :  { %v4769_v57 = vpop.f32.mrb[3].mxu1 }
 0x179   :  { %v262_v9 = vpop.f32.mrb[2].mxu0 }
 0x17a   :  { %v263_v59 = vadd.f32 %v262_v9, %v172_v3  ;;  %v4725_v16 = vpop.f32.mrb[3].mxu0 }
 0x181   :  { %v342_v29 = vpop.f32.mrb[4].mxu0 }
 0x182   :  { %v343_v34 = vadd.f32 %v342_v29, %v263_v59  ;;  %v4736_v40 = vpop.f32.mrb[5].mxu0  ;;  %v6480_v59 = vpack.c.bf16 %v1280_v1, %v1273_v61  ;;  %v4351_v29 = vld [vmem:[%s7104_s8 + $0x68] sm:$0xff] }
 0x184   :  { %v420_v21 = vadd.f32 %v419_v11, %v343_v34 }
 0x189   :  { %v502_v52 = vpop.f32.mrb[6].mxu0 }
 0x18a   :  { %v503_v56 = vadd.f32 %v502_v52, %v420_v21  ;;  %v4758_v57 = vpop.f32.mrb[7].mxu0  ;;  %v4353_v21 = vld [vmem:[%s7104_s8 + $0x78] sm:$0xff] }
 0x18c   :  { %v578_v2 = vadd.f32 %v577_v51, %v503_v56 }
 0x18e   :  { %v6469_v3 = vadd.f32 %v4341_v60, %v578_v2  ;;  %v2782_v60 = vand.u32 4294901760, %v4350_v25  ;;  %v2785_v2 = vand.u32 4294901760, %v4351_v29 }
 0x190   :  { %v1671_v4 = vsel %vm621_vm5, %v6469_v3, 0 }
 0x191   :  { %v6475_v9 = vand.u32 4294901760, %v1671_v4 }
 0x193   :  { %v6478_v11 = vsub.f32 %v1671_v4, %v6475_v9 }
 0x195   :  { %v6483_v16 = vand.u32 4294901760, %v6478_v11 }
 0x197   :  { %v1749_v51 = vsub.f32 %v6478_v11, %v6483_v16 }
 0x199   :  { %v6487_v17 = vand.u32 4294901760, %v1749_v51  ;;  %v2791_v51 = vand.u32 4294901760, %v4353_v21 }
 0x19b   :  { %4967 = vmatmul.mubr.f32.vlgmr.msra.gmra.mrb[10].mxu0 %v6487_v17 }
 0x19c   :  { %5594 = vmatpush3.bf16.msra.mxu0 %v6379_v50  ;;  %4985 = vmatprep.mubr.msk.f32.mxu0 %vm5989_vm0, %v5990_v23  ;;  %v4346_v50 = vld [vmem:[%s7104_s8 + $0x40] sm:$0xff] }
 0x19d   :  { %5595 = vmatprep.subr.bf16.mxu0 %v5988_v13 }
 0x1a0   :  { %5597 = vmatpush3.bf16.msra.mxu0 %v6384_v55  ;;  %v4347_v55 = vld [vmem:[%s7104_s8 + $0x48] sm:$0xff] }
 0x1a1   :  { %5598 = vmatprep.subr.bf16.mxu0 %v5988_v13 }
 0x1a4   :  { %5600 = vmatpush3.bf16.msra.mxu0 %v6398_v0  ;;  %v2770_v0 = vand.u32 4294901760, %v4346_v50 }
 0x1a5   :  { %5601 = vmatprep.subr.bf16.mxu0 %v5988_v13 }
 0x1a6   :  { %v6527_v35 = vsub.f32 %v4346_v50, %v2770_v0 }
 0x1a8   :  { %5603 = vmatpush3.bf16.msra.mxu0 %v6408_v5  ;;  %v2773_v5 = vand.u32 4294901760, %v4347_v55  ;;  %v2855_v52 = vand.u32 4294901760, %v6527_v35 }
 0x1a9   :  { %5604 = vmatprep.subr.bf16.mxu0 %v5988_v13 }
 0x1aa   :  { %v6529_v43 = vsub.f32 %v4347_v55, %v2773_v5  ;;  %v2856_v50 = vsub.f32 %v6527_v35, %v2855_v52 }
 0x1ab   :  { %4986 = vmatmul.mubr.f32.vlgmr.msra.gmra.mrb[10].mxu0 %v6475_v9 }
 0x1ac   :  { %5606 = vmatpush3.bf16.msra.mxu0 %v5605_v6  ;;  %5004 = vmatprep.mubr.msk.f32.mxu0 %vm5989_vm0, %v5990_v23  ;;  %v4348_v6 = vld [vmem:[%s7104_s8 + $0x50] sm:$0xff]  ;;  %v2862_v56 = vand.u32 4294901760, %v6529_v43  ;;  %v2857_v42 = vand.u32 4294901760, %v2856_v50 }
 0x1ad   :  { %5607 = vmatprep.subr.bf16.mxu0 %v5988_v13  ;;  %v2776_v61 = vand.u32 4294901760, %v4348_v6 }
 0x1ae   :  { %v2863_v55 = vsub.f32 %v6529_v43, %v2862_v56 }
 0x1af   :  { %v6544_v34 = vsub.f32 %v4348_v6, %v2776_v61  ;;  %v6571_v6 = vpack.c.bf16 %v2785_v2, %v2782_v60 }
 0x1b0   :  { %5609 = vmatpush3.bf16.msra.mxu0 %v5608_v10  ;;  %v4349_v10 = vld [vmem:[%s7104_s8 + $0x58] sm:$0xff]  ;;  %v2864_v63 = vand.u32 4294901760, %v2863_v55 }
 0x1b1   :  { %5610 = vmatprep.subr.bf16.mxu0 %v5988_v13  ;;  %v2779_v1 = vand.u32 4294901760, %v4349_v10 }
 0x1b2   :  { %v5737_v50 = vpack.c.bf16 %v2864_v63, %v2857_v42 }
 0x1b3   :  { %v6546_v40 = vsub.f32 %v4349_v10, %v2779_v1  ;;  %v6557_v57 = vpack.c.bf16 %v2779_v1, %v2776_v61  ;;  %v6573_v10 = vsub.f32 %v4350_v25, %v2782_v60  ;;  %v6575_v61 = vsub.f32 %v4351_v29, %v2785_v2 }
 0x1b4   :  { %5612 = vmatpush3.bf16.msra.mxu0 %v5611_v7  ;;  %v6534_v7 = vpack.c.bf16 %v2773_v5, %v2770_v0  ;;  %v2869_v0 = vand.u32 4294901760, %v6544_v34  ;;  %v6589_v29 = vsub.f32 %v4353_v21, %v2791_v51 }
 0x1b5   :  { %5613 = vmatprep.subr.bf16.mxu0 %v5988_v13  ;;  %v2876_v5 = vand.u32 4294901760, %v6546_v40  ;;  %v2883_v60 = vand.u32 4294901760, %v6573_v10  ;;  %v2890_v2 = vand.u32 4294901760, %v6575_v61 }
 0x1b6   :  { %v2870_v62 = vsub.f32 %v6544_v34, %v2869_v0 }
 0x1b7   :  { %v2877_v54 = vsub.f32 %v6546_v40, %v2876_v5  ;;  %v2884_v45 = vsub.f32 %v6573_v10, %v2883_v60 }
 0x1b8   :  { %5615 = vmatpush3.bf16.msra.mxu0 %v5614_v8  ;;  %v4352_v8 = vld [vmem:[%s7104_s8 + $0x70] sm:$0xff]  ;;  %v2871_v55 = vand.u32 4294901760, %v2870_v62 }
 0x1b9   :  { %5724 = vmatprep.subr.bf16.mxu0 %v5988_v13  ;;  %v2788_v4 = vand.u32 4294901760, %v4352_v8  ;;  %v2878_v53 = vand.u32 4294901760, %v2877_v54  ;;  %v2885_v54 = vand.u32 4294901760, %v2884_v45 }
 0x1bb   :  { %5005 = vmatmul.mubr.f32.vlgmr.msra.gmra.mrb[10].mxu0 %v6478_v11  ;;  %v6578_v1 = vpack.c.bf16 %v2791_v51, %v2788_v4  ;;  %v6587_v25 = vsub.f32 %v4352_v8, %v2788_v4  ;;  %v2891_v8 = vsub.f32 %v6575_v61, %v2890_v2  ;;  %v2904_v4 = vand.u32 4294901760, %v6589_v29 }
 0x1bc   :  { %5726 = vmatpush3.bf16.msra.mxu0 %v6534_v7  ;;  %5194 = vmatprep.mubr.msk.f32.mxu0 %vm5989_vm0, %v5990_v23  ;;  %v5740_v42 = vpack.c.bf16 %v2878_v53, %v2871_v55  ;;  %v5752_v55 = vpack.c.bf16 %v6546_v40, %v6544_v34  ;;  %v2217_v40 = vld [vmem:[%s7105_s9 + $0x30] sm:$0xff] }
 0x1bd   :  { %5727 = vmatprep.subr.bf16.mxu0 %v5988_v13  ;;  %v2897_v21 = vand.u32 4294901760, %v6587_v25  ;;  %v2892_v62 = vand.u32 4294901760, %v2891_v8  ;;  %v2905_v51 = vsub.f32 %v6589_v29, %v2904_v4  ;;  %v5758_v8 = vpack.c.bf16 %v6589_v29, %v6587_v25 }
 0x1bf   :  { %v2898_v63 = vsub.f32 %v6587_v25, %v2897_v21  ;;  %v5743_v44 = vpack.c.bf16 %v2892_v62, %v2885_v54  ;;  %v2906_v53 = vand.u32 4294901760, %v2905_v51 }
 0x1c0   :  { %5729 = vmatpush3.bf16.msra.mxu0 %v6557_v57 }
 0x1c1   :  { %5730 = vmatprep.subr.bf16.mxu0 %v5988_v13 }
 0x1c4   :  { %5732 = vmatpush3.bf16.msra.mxu0 %v6571_v6 }
 0x1c5   :  { %5733 = vmatprep.subr.bf16.mxu0 %v5988_v13 }
 0x1c8   :  { %5735 = vmatpush3.bf16.msra.mxu0 %v6578_v1 }
 0x1c9   :  { %5736 = vmatprep.subr.bf16.mxu0 %v5988_v13 }
 0x1cb   :  { %5195 = vmatmul.mubr.f32.vlgmr.msra.gmra.mrb[12].mxu0 %v6487_v17  ;;  %v2899_v17 = vand.u32 4294901760, %v2898_v63 }
 0x1cc   :  { %5738 = vmatpush3.bf16.msra.mxu0 %v5737_v50  ;;  %5213 = vmatprep.mubr.msk.f32.mxu0 %vm5989_vm0, %v5990_v23  ;;  %v5749_v50 = vpack.c.bf16 %v6529_v43, %v6527_v35  ;;  %v5776_v35 = vpack.c.bf16 %v2876_v5, %v2869_v0  ;;  %v6799_v43 = vsub.f32 %v2211_v33, %v2223_v37 }
 0x1cd   :  { %5739 = vmatprep.subr.bf16.mxu0 %v5988_v13  ;;  %v5746_v45 = vpack.c.bf16 %v2906_v53, %v2899_v17 }
 0x1d0   :  { %5741 = vmatpush3.bf16.msra.mxu0 %v5740_v42  ;;  %v4344_v42 = vld [vmem:[%s7103_s7] ss:$0 sm:$0xff] }
 0x1d1   :  { %5742 = vmatprep.subr.bf16.mxu0 %v5988_v13 }
 0x1d4   :  { %5744 = vmatpush3.bf16.msra.mxu0 %v5743_v44  ;;  %v5755_v44 = vpack.c.bf16 %v6575_v61, %v6573_v10  ;;  %v2308_v61 = vand.u32 4294901760, %v6799_v43 }
 0x1d5   :  { %5745 = vmatprep.subr.bf16.mxu0 %v5988_v13 }
 0x1d8   :  { %5747 = vmatpush3.bf16.msra.mxu0 %v5746_v45 }
 0x1d9   :  { %5748 = vmatprep.subr.bf16.mxu0 %v5988_v13 }
 0x1db   :  { %5214 = vmatmul.mubr.f32.vlgmr.msra.gmra.mrb[12].mxu0 %v6475_v9 }
 0x1dc   :  { %5750 = vmatpush3.bf16.msra.mxu0 %v5749_v50  ;;  %5232 = vmatprep.mubr.msk.f32.mxu0 %vm5989_vm0, %v5990_v23 }
 0x1dd   :  { %5751 = vmatprep.subr.bf16.mxu0 %v5988_v13 }
 0x1e0   :  { %5753 = vmatpush3.bf16.msra.mxu0 %v5752_v55 }
 0x1e1   :  { %5754 = vmatprep.subr.bf16.mxu0 %v5988_v13 }
 0x1e4   :  { %5756 = vmatpush3.bf16.msra.mxu0 %v5755_v44  ;;  %v5773_v44 = vpack.c.bf16 %v2862_v56, %v2855_v52  ;;  %v2218_v52 = vld [vmem:[%s7105_s9 + $0x38] sm:$0xff] }
 0x1e5   :  { %5757 = vmatprep.subr.bf16.mxu0 %v5988_v13  ;;  %v2244_v10 = vand.u32 4294901760, %v2218_v52 }
 0x1e8   :  { %5759 = vmatpush3.bf16.msra.mxu0 %v5758_v8 }
 0x1e9   :  { %v1158_v54 = vpop.f32.mrb[8].mxu0  ;;  %5760 = vmatprep.subr.bf16.mxu0 %v5988_v13 }
 0x1ea   :  { %v5868_v62 = vadd.f32 %v4344_v42, %v1158_v54  ;;  %v4883_v63 = vpop.f32.mrb[9].mxu0 }
 0x1eb   :  { %5233 = vmatmul.mubr.f32.vlgmr.msra.gmra.mrb[12].mxu0 %v6478_v11 }
 0x1ec   :  { %v1162_v51 = vmax.f32 %v5868_v62, 0.0  ;;  %5762 = vmatpush3.bf16.msra.mxu0 %v6534_v7  ;;  %5251 = vmatprep.mubr.msk.f32.mxu0 %vm5989_vm0, %v5990_v23 }
 0x1ed   :  { %5763 = vmatprep.subr.bf16.mxu0 %v5988_v13 }
 0x1ee   :  { %v1175_v17 = vsel %vm92_vm4, %v1162_v51, 0 }
 0x1ef   :  { %v6641_v53 = vand.u32 4294901760, %v1175_v17 }
 0x1f0   :  { %5765 = vmatpush3.bf16.msra.mxu0 %v6557_v57 }
 0x1f1   :  { %v1247_v45 = vsub.f32 %v1175_v17, %v6641_v53  ;;  %5766 = vmatprep.subr.bf16.mxu0 %v5988_v13 }
 0x1f3   :  { %v1248_v50 = vand.u32 4294901760, %v1247_v45 }
 0x1f4   :  { %5768 = vmatpush3.bf16.msra.mxu0 %v6571_v6 }
 0x1f5   :  { %5769 = vmatprep.subr.bf16.mxu0 %v5988_v13  ;;  %v1249_v11 = vsub.f32 %v1247_v45, %v1248_v50 }
 0x1f7   :  { %v1250_v55 = vand.u32 4294901760, %v1249_v11 }
 0x1f8   :  { %5771 = vmatpush3.bf16.msra.mxu0 %v6578_v1 }
 0x1f9   :  { %4893 = vmatmul.mubr.f32.vlgmr.msra.gmra.mrb[4].mxu1 %v1250_v55  ;;  %5772 = vmatprep.subr.bf16.mxu0 %v5988_v13 }
 0x1fa   :  { %5552 = vmatpush3.bf16.msra.mxu1 %v6458_v15  ;;  %4903 = vmatprep.mubr.msk.f32.mxu1 %vm5989_vm0, %v5990_v23  ;;  %v5779_v15 = vpack.c.bf16 %v2890_v2, %v2883_v60  ;;  %v6827_v60 = vsub.f32 %v2218_v52, %v2244_v10  ;;  %v2309_v2 = vsub.f32 %v6799_v43, %v2308_v61 }
 0x1fb   :  { %5252 = vmatmul.mubr.f32.vlgmr.msra.gmra.mrb[12].mxu0 %v6483_v16  ;;  %5553 = vmatprep.subr.bf16.mxu1 %v5988_v13 }
 0x1fc   :  { %5774 = vmatpush3.bf16.msra.mxu0 %v5773_v44  ;;  %5270 = vmatprep.mubr.msk.f32.mxu0 %vm5989_vm0, %v5990_v23 }
 0x1fd   :  { %5775 = vmatprep.subr.bf16.mxu0 %v5988_v13 }
 0x1fe   :  { %5555 = vmatpush3.bf16.msra.mxu1 %v6460_v26  ;;  %v5782_v26 = vpack.c.bf16 %v2904_v4, %v2897_v21  ;;  %v2310_v4 = vand.u32 4294901760, %v2309_v2  ;;  %v4359_v2 = vld [vmem:[%s7105_s9 + $0x68] sm:$0xff] }
 0x1ff   :  { %5556 = vmatprep.subr.bf16.mxu1 %v5988_v13 }
 0x200   :  { %5777 = vmatpush3.bf16.msra.mxu0 %v5776_v35 }
 0x201   :  { %4904 = vmatmul.mubr.f32.vlgmr.msra.gmra.mrb[4].mxu1 %v6641_v53  ;;  %5778 = vmatprep.subr.bf16.mxu0 %v5988_v13 }
 0x202   :  { %5558 = vmatpush3.bf16.msra.mxu1 %v5557_v28  ;;  %4914 = vmatprep.mubr.msk.f32.mxu1 %vm5989_vm0, %v5990_v23  ;;  %v2232_v28 = vand.u32 4294901760, %v2214_v46 }
 0x203   :  { %5559 = vmatprep.subr.bf16.mxu1 %v5988_v13 }
 0x204   :  { %5780 = vmatpush3.bf16.msra.mxu0 %v5779_v15 }
 0x205   :  { %5781 = vmatprep.subr.bf16.mxu0 %v5988_v13 }
 0x206   :  { %5561 = vmatpush3.bf16.msra.mxu1 %v5560_v48 }
 0x207   :  { %5562 = vmatprep.subr.bf16.mxu1 %v5988_v13 }
 0x208   :  { %5783 = vmatpush3.bf16.msra.mxu0 %v5782_v26 }
 0x209   :  { %4915 = vmatmul.mubr.f32.vlgmr.msra.gmra.mrb[4].mxu1 %v1247_v45  ;;  %5784 = vmatprep.subr.bf16.mxu0 %v5988_v13 }
 0x20a   :  { %5564 = vmatpush3.bf16.msra.mxu1 %v6424_v18  ;;  %4925 = vmatprep.mubr.msk.f32.mxu1 %vm5989_vm0, %v5990_v23 }
 0x20b   :  { %5271 = vmatmul.mubr.f32.vlgmr.msra.gmra.mrb[12].mxu0 %v6475_v9  ;;  %5565 = vmatprep.subr.bf16.mxu1 %v5988_v13 }
 0x20c   :  { %5786 = vmatpush3.bf16.msra.mxu0 %v6534_v7  ;;  %5289 = vmatprep.mubr.msk.f32.mxu0 %vm5989_vm0, %v5990_v23 }
 0x20d   :  { %5787 = vmatprep.subr.bf16.mxu0 %v5988_v13 }
 0x20e   :  { %5567 = vmatpush3.bf16.msra.mxu1 %v6443_v12 }
 0x20f   :  { %5568 = vmatprep.subr.bf16.mxu1 %v5988_v13 }
 0x210   :  { %5789 = vmatpush3.bf16.msra.mxu0 %v6557_v57  ;;  %v6813_v57 = vsub.f32 %v2214_v46, %v2232_v28 }
 0x211   :  { %4926 = vmatmul.mubr.f32.vlgmr.msra.gmra.mrb[4].mxu1 %v1248_v50  ;;  %5790 = vmatprep.subr.bf16.mxu0 %v5988_v13 }
 0x212   :  { %5570 = vmatpush3.bf16.msra.mxu1 %v6473_v14  ;;  %4936 = vmatprep.mubr.msk.f32.mxu1 %vm5989_vm0, %v5990_v23  ;;  %v2215_v14 = vld [vmem:[%s7105_s9 + $0x20] sm:$0xff]  ;;  %v2329_v42 = vand.u32 4294901760, %v6813_v57 }
 0x213   :  { %5571 = vmatprep.subr.bf16.mxu1 %v5988_v13 }
 0x214   :  { %5792 = vmatpush3.bf16.msra.mxu0 %v6571_v6  ;;  %v2241_v6 = vand.u32 4294901760, %v2217_v40  ;;  %v2330_v63 = vsub.f32 %v6813_v57, %v2329_v42 }
 0x215   :  { %5793 = vmatprep.subr.bf16.mxu0 %v5988_v13 }
 0x216   :  { %5573 = vmatpush3.bf16.msra.mxu1 %v6480_v59  ;;  %v2235_v59 = vand.u32 4294901760, %v2215_v14  ;;  %v6823_v25 = vpack.c.bf16 %v2244_v10, %v2241_v6  ;;  %v6825_v29 = vsub.f32 %v2217_v40, %v2241_v6 }
 0x217   :  { %5574 = vmatprep.subr.bf16.mxu1 %v5988_v13 }
 0x218   :  { %5795 = vmatpush3.bf16.msra.mxu0 %v6578_v1  ;;  %v6816_v0 = vsub.f32 %v2215_v14, %v2235_v59  ;;  %v2350_v26 = vand.u32 4294901760, %v6825_v29 }
 0x219   :  { %4937 = vmatmul.mubr.f32.vlgmr.msra.gmra.mrb[4].mxu1 %v6641_v53  ;;  %5406 = vmatprep.subr.mxu0 %v5990_v23 }
 0x21a   :  { %5576 = vmatpush3.bf16.msra.mxu1 %v6424_v18  ;;  %4947 = vmatprep.mubr.msk.f32.mxu1 %vm5989_vm0, %v5990_v23  ;;  %v5629_v18 = vpack.c.bf16 %v1766_v38, %v1759_v36  ;;  %v5635_v36 = vpack.c.bf16 %v7121_v24, %v7120_v22  ;;  %v7122_v38 = vand.u32 4294901760, %v6352_v39  ;;  %v2212_v39 = vld [vmem:[%s7105_s9 + $0x8] sm:$0xff]  ;;  %v2336_v45 = vand.u32 4294901760, %v6816_v0 }
 0x21b   :  { %5290 = vmatmul.mubr.f32.vlgmr.msra.gmra.mrb[12].mxu0 %v6475_v9  ;;  %5577 = vmatprep.subr.bf16.mxu1 %v5988_v13 }
 0x21c   :  { %5408 = vmatprep.mubr.msk.f32.mxu0 %vm5989_vm0, %v5990_v23  ;;  %v5638_v31 = vpack.c.bf16 %v7123_v30, %v7122_v38  ;;  %v2337_v55 = vsub.f32 %v6816_v0, %v2336_v45 }
 0x21e   :  { %5579 = vmatpush3.bf16.msra.mxu1 %v6443_v12  ;;  %v5632_v12 = vpack.c.bf16 %v7119_v20, %v7118_v19  ;;  %v2338_v35 = vand.u32 4294901760, %v2337_v55  ;;  %v2351_v20 = vsub.f32 %v6825_v29, %v2350_v26 }
 0x21f   :  { %5616 = vmatprep.subr.bf16.mxu1 %v5988_v13 }
 0x220   :  { %v2352_v22 = vand.u32 4294901760, %v2351_v20 }
 0x221   :  { %4948 = vmatmul.mubr.f32.vlgmr.msra.gmra.mrb[4].mxu1 %v6641_v53  ;;  %v2331_v53 = vand.u32 4294901760, %v2330_v63 }
 0x222   :  { %5618 = vmatpush3.bf16.msra.mxu1 %v6331_v27  ;;  %5023 = vmatprep.mubr.msk.f32.mxu1 %vm5989_vm0, %v5990_v23 }
 0x223   :  { %5619 = vmatprep.subr.bf16.mxu1 %v5988_v13 }
 0x226   :  { %5621 = vmatpush3.bf16.msra.mxu1 %v6360_v41 }
 0x227   :  { %5622 = vmatprep.subr.bf16.mxu1 %v5988_v13 }
 0x22a   :  { %5624 = vmatpush3.bf16.msra.mxu1 %v6377_v49 }
 0x22b   :  { %5625 = vmatprep.subr.bf16.mxu1 %v5988_v13 }
 0x22e   :  { %5627 = vmatpush3.bf16.msra.mxu1 %v6393_v58 }
 0x22f   :  { %5628 = vmatprep.subr.bf16.mxu1 %v5988_v13 }
 0x231   :  { %5024 = vmatmul.mubr.f32.vlgmr.msra.gmra.mrb[6].mxu1 %v6483_v16 }
 0x232   :  { %5630 = vmatpush3.bf16.msra.mxu1 %v5629_v18  ;;  %5042 = vmatprep.mubr.msk.f32.mxu1 %vm5989_vm0, %v5990_v23  ;;  %v2357_v18 = vand.u32 4294901760, %v6827_v60 }
 0x233   :  { %5631 = vmatprep.subr.bf16.mxu1 %v5988_v13 }
 0x236   :  { %5633 = vmatpush3.bf16.msra.mxu1 %v5632_v12  ;;  %v2358_v12 = vsub.f32 %v6827_v60, %v2357_v18 }
 0x237   :  { %5634 = vmatprep.subr.bf16.mxu1 %v5988_v13 }
 0x238   :  { %v2359_v24 = vand.u32 4294901760, %v2358_v12 }
 0x23a   :  { %5636 = vmatpush3.bf16.msra.mxu1 %v5635_v36  ;;  %v5674_v36 = vpack.c.bf16 %v2359_v24, %v2352_v22 }
 0x23b   :  { %5637 = vmatprep.subr.bf16.mxu1 %v5988_v13 }
 0x23e   :  { %5639 = vmatpush3.bf16.msra.mxu1 %v5638_v31 }
 0x23f   :  { %5640 = vmatprep.subr.bf16.mxu1 %v5988_v13 }
 0x241   :  { %5043 = vmatmul.mubr.f32.vlgmr.msra.gmra.mrb[6].mxu1 %v6475_v9 }
 0x242   :  { %5642 = vmatpush3.bf16.msra.mxu1 %v6331_v27  ;;  %5061 = vmatprep.mubr.msk.f32.mxu1 %vm5989_vm0, %v5990_v23 }
 0x243   :  { %5643 = vmatprep.subr.bf16.mxu1 %v5988_v13 }
 0x246   :  { %5645 = vmatpush3.bf16.msra.mxu1 %v6360_v41  ;;  %v2226_v41 = vand.u32 4294901760, %v2212_v39 }
 0x247   :  { %5646 = vmatprep.subr.bf16.mxu1 %v5988_v13 }
 0x248   :  { %v6801_v7 = vsub.f32 %v2212_v39, %v2226_v41 }
 0x24a   :  { %5648 = vmatpush3.bf16.msra.mxu1 %v6377_v49  ;;  %v6779_v49 = vpack.c.bf16 %v2226_v41, %v2223_v37  ;;  %v2315_v1 = vand.u32 4294901760, %v6801_v7  ;;  %v5677_v38 = vpack.c.bf16 %v6801_v7, %v6799_v43 }
 0x24b   :  { %5649 = vmatprep.subr.bf16.mxu1 %v5988_v13 }
 0x24c   :  { %v2316_v21 = vsub.f32 %v6801_v7, %v2315_v1  ;;  %v5701_v33 = vpack.c.bf16 %v2315_v1, %v2308_v61 }
 0x24e   :  { %5651 = vmatpush3.bf16.msra.mxu1 %v6393_v58  ;;  %v2213_v58 = vld [vmem:[%s7105_s9 + $0x10] sm:$0xff]  ;;  %v2317_v54 = vand.u32 4294901760, %v2316_v21 }
 0x24f   :  { %5652 = vmatprep.subr.bf16.mxu1 %v5988_v13  ;;  %v2229_v47 = vand.u32 4294901760, %v2213_v58 }
 0x250   :  { %v5665_v51 = vpack.c.bf16 %v2317_v54, %v2310_v4  ;;  %v4360_v4 = vld [vmem:[%s7105_s9 + $0x70] sm:$0xff] }
 0x251   :  { %5062 = vmatmul.mubr.f32.vlgmr.msra.gmra.mrb[6].mxu1 %v6475_v9  ;;  %v6789_v48 = vpack.c.bf16 %v2232_v28, %v2229_v47  ;;  %v2216_v9 = vld [vmem:[%s7105_s9 + $0x28] sm:$0xff]  ;;  %v6811_v56 = vsub.f32 %v2213_v58, %v2229_v47  ;;  %v5710_v58 = vpack.c.bf16 %v2357_v18, %v2350_v26 }
 0x252   :  { %5080 = vmatprep.mubr.msk.f32.mxu1 %vm5989_vm0, %v5990_v23  ;;  %5654 = vmatpush3.bf16.msra.mxu1 %v6779_v49  ;;  %v2238_v16 = vand.u32 4294901760, %v2216_v9 }
 0x253   :  { %5655 = vmatprep.subr.bf16.mxu1 %v5988_v13  ;;  %v2322_v8 = vand.u32 4294901760, %v6811_v56  ;;  %v5680_v30 = vpack.c.bf16 %v6813_v57, %v6811_v56 }
 0x254   :  { %v6803_v34 = vpack.c.bf16 %v2238_v16, %v2235_v59  ;;  %v6818_v5 = vsub.f32 %v2216_v9, %v2238_v16 }
 0x255   :  { %v2323_v62 = vsub.f32 %v6811_v56, %v2322_v8  ;;  %v5704_v39 = vpack.c.bf16 %v2329_v42, %v2322_v8  ;;  %v4355_v56 = vld [vmem:[%s7105_s9 + $0x48] sm:$0xff]  ;;  %v4361_v8 = vld [vmem:[%s7105_s9 + $0x78] sm:$0xff] }
 0x256   :  { %5657 = vmatpush3.bf16.msra.mxu1 %v6789_v48  ;;  %v2343_v50 = vand.u32 4294901760, %v6818_v5  ;;  %v5683_v31 = vpack.c.bf16 %v6818_v5, %v6816_v0  ;;  %v3323_v0 = vand.u32 4294901760, %v4355_v56 }
 0x257   :  { %5658 = vmatprep.subr.bf16.mxu1 %v5988_v13  ;;  %v2324_v17 = vand.u32 4294901760, %v2323_v62 }
 0x258   :  { %v2344_v44 = vsub.f32 %v6818_v5, %v2343_v50  ;;  %v5707_v37 = vpack.c.bf16 %v2343_v50, %v2336_v45  ;;  %v4357_v5 = vld [vmem:[%s7105_s9 + $0x58] sm:$0xff]  ;;  %v6913_v61 = vsub.f32 %v4355_v56, %v3323_v0  ;;  %v3341_v45 = vand.u32 4294901760, %v4361_v8 }
 0x259   :  { %v5668_v11 = vpack.c.bf16 %v2331_v53, %v2324_v17  ;;  %v3329_v1 = vand.u32 4294901760, %v4357_v5  ;;  %v3338_v53 = vand.u32 4294901760, %v4360_v4 }
 0x25a   :  { %5660 = vmatpush3.bf16.msra.mxu1 %v6803_v34  ;;  %v2345_v15 = vand.u32 4294901760, %v2344_v44  ;;  %v3412_v54 = vand.u32 4294901760, %v6913_v61 }
 0x25b   :  { %5661 = vmatprep.subr.bf16.mxu1 %v5988_v13 }
 0x25c   :  { %v5671_v19 = vpack.c.bf16 %v2345_v15, %v2338_v35 }
 0x25e   :  { %5663 = vmatpush3.bf16.msra.mxu1 %v6823_v25 }
 0x25f   :  { %5664 = vmatprep.subr.bf16.mxu1 %v5988_v13 }
 0x28e   :  { %v6771_v27 = vpop.f32.mrb[10].mxu0 }
 0x28f   :  { %v5006_v32 = vpop.f32.mrb[11].mxu0 }
 0x290   :  { %v5686_v32 = vpack.c.bf16 %v6827_v60, %v6825_v29  ;;  %v4358_v60 = vld [vmem:[%s7105_s9 + $0x60] sm:$0xff] }
 0x291   :  { %v3332_v63 = vand.u32 4294901760, %v4358_v60 }
 0x293   :  { %v6960_v15 = vsub.f32 %v4358_v60, %v3332_v63 }
 0x2ee   :  { %v3302_v41 = vpop.f32.mrb[12].mxu0 }
 0x2ef   :  { %v5291_v46 = vpop.f32.mrb[13].mxu0  ;;  %v3306_v57 = vmul.f32 %v3302_v41, %v6469_v3 }
 0x2f1   :  { %v3317_v6 = vsel %vm621_vm5, %v3306_v57, 0 }
 0x2f2   :  { %v6918_v29 = vand.u32 4294901760, %v3317_v6 }
 0x2f4   :  { %v6946_v17 = vsub.f32 %v3317_v6, %v6918_v29 }
 0x2f6   :  { %v3394_v18 = vand.u32 4294901760, %v6946_v17 }
 0x324   :  { %v2206_v47 = vpop.f32.mrb[6].mxu1 }
 0x325   :  { %v5870_v28 = vadd.f32 %v2206_v47, %v6771_v27  ;;  %v5063_v14 = vpop.f32.mrb[7].mxu1  ;;  %v4354_v27 = vld [vmem:[%s7105_s9 + $0x40] sm:$0xff] }
 0x327   :  { %v2210_v9 = vmul.f32 %v5870_v28, %v6469_v3 }
 0x329   :  { %v2220_v59 = vsel %vm621_vm5, %v2210_v9, 0 }
 0x32a   :  { %v6856_v16 = vand.u32 4294901760, %v2220_v59 }
 0x32c   :  { %v2296_v43 = vsub.f32 %v2220_v59, %v6856_v16 }
 0x32e   :  { %v2297_v7 = vand.u32 4294901760, %v2296_v43 }
 0x330   :  { %v2298_v40 = vsub.f32 %v2296_v43, %v2297_v7 }
 0x332   :  { %v2299_v52 = vand.u32 4294901760, %v2298_v40 }
 0x334   :  { %5081 = vmatmul.mubr.f32.vlgmr.msra.gmra.mrb[4].mxu1 %v2299_v52 }
 0x335   :  { %5666 = vmatpush3.bf16.msra.mxu1 %v5665_v51  ;;  %5099 = vmatprep.mubr.msk.f32.mxu1 %vm5989_vm0, %v5990_v23  ;;  %v3335_v51 = vand.u32 4294901760, %v4359_v2 }
 0x336   :  { %5667 = vmatprep.subr.bf16.mxu1 %v5988_v13 }
 0x337   :  { %v6958_v35 = vpack.c.bf16 %v3335_v51, %v3332_v63  ;;  %v6962_v26 = vsub.f32 %v4359_v2, %v3335_v51  ;;  %v4345_v2 = vld [vmem:[%s7107_s11] ss:$0 sm:$0xff]  ;;  %s5991_s11 = smov [#allocation3]  }
 0x339   :  { %5669 = vmatpush3.bf16.msra.mxu1 %v5668_v11  ;;  %v3413_v11 = vsub.f32 %v6913_v61, %v3412_v54 }
 0x33a   :  { %5670 = vmatprep.subr.bf16.mxu1 %v5988_v13 }
 0x33b   :  { %v3414_v12 = vand.u32 4294901760, %v3413_v11 }
 0x33d   :  { %5672 = vmatpush3.bf16.msra.mxu1 %v5671_v19  ;;  %v6966_v19 = vpack.c.bf16 %v3341_v45, %v3338_v53 }
 0x33e   :  { %5673 = vmatprep.subr.bf16.mxu1 %v5988_v13 }
 0x341   :  { %5675 = vmatpush3.bf16.msra.mxu1 %v5674_v36  ;;  %v6975_v36 = vsub.f32 %v4360_v4, %v3338_v53 }
 0x342   :  { %5676 = vmatprep.subr.bf16.mxu1 %v5988_v13 }
 0x343   :  { %v3447_v46 = vand.u32 4294901760, %v6975_v36 }
 0x344   :  { %5100 = vmatmul.mubr.f32.vlgmr.msra.gmra.mrb[4].mxu1 %v6856_v16 }
 0x345   :  { %5678 = vmatpush3.bf16.msra.mxu1 %v5677_v38  ;;  %5118 = vmatprep.mubr.msk.f32.mxu1 %vm5989_vm0, %v5990_v23  ;;  %v6977_v38 = vsub.f32 %v4361_v8, %v3341_v45  ;;  %v7124_v45 = vlaneseq }
 0x346   :  { %5679 = vmatprep.subr.bf16.mxu1 %v5988_v13 }
 0x347   :  { %v3454_v47 = vand.u32 4294901760, %v6977_v38 }
 0x349   :  { %5681 = vmatpush3.bf16.msra.mxu1 %v5680_v30  ;;  %v3433_v30 = vand.u32 4294901760, %v6960_v15 }
 0x34a   :  { %5682 = vmatprep.subr.bf16.mxu1 %v5988_v13 }
 0x34b   :  { %v3434_v41 = vsub.f32 %v6960_v15, %v3433_v30 }
 0x34d   :  { %5684 = vmatpush3.bf16.msra.mxu1 %v5683_v31  ;;  %v3440_v31 = vand.u32 4294901760, %v6962_v26  ;;  %v3435_v9 = vand.u32 4294901760, %v3434_v41 }
 0x34e   :  { %5685 = vmatprep.subr.bf16.mxu1 %v5988_v13 }
 0x34f   :  { %v5851_v6 = vpack.c.bf16 %v3440_v31, %v3433_v30 }
 0x351   :  { %5687 = vmatpush3.bf16.msra.mxu1 %v5686_v32  ;;  %v3395_v32 = vsub.f32 %v6946_v17, %v3394_v18 }
 0x352   :  { %5688 = vmatprep.subr.bf16.mxu1 %v5988_v13 }
 0x353   :  { %v3396_v28 = vand.u32 4294901760, %v3395_v32 }
 0x354   :  { %5119 = vmatmul.mubr.f32.vlgmr.msra.gmra.mrb[4].mxu1 %v2296_v43  ;;  %v3455_v43 = vsub.f32 %v6977_v38, %v3454_v47 }
 0x355   :  { %5690 = vmatpush3.bf16.msra.mxu1 %v6779_v49  ;;  %5137 = vmatprep.mubr.msk.f32.mxu1 %vm5989_vm0, %v5990_v23 }
 0x356   :  { %5691 = vmatprep.subr.bf16.mxu1 %v5988_v13  ;;  %v3456_v52 = vand.u32 4294901760, %v3455_v43 }
 0x359   :  { %5693 = vmatpush3.bf16.msra.mxu1 %v6789_v48 }
 0x35a   :  { %5694 = vmatprep.subr.bf16.mxu1 %v5988_v13 }
 0x35d   :  { %5696 = vmatpush3.bf16.msra.mxu1 %v6803_v34 }
 0x35e   :  { %5697 = vmatprep.subr.bf16.mxu1 %v5988_v13 }
 0x361   :  { %5699 = vmatpush3.bf16.msra.mxu1 %v6823_v25 }
 0x362   :  { %5700 = vmatprep.subr.bf16.mxu1 %v5988_v13 }
 0x364   :  { %5138 = vmatmul.mubr.f32.vlgmr.msra.gmra.mrb[4].mxu1 %v2297_v7 }
 0x365   :  { %5702 = vmatpush3.bf16.msra.mxu1 %v5701_v33  ;;  %5156 = vmatprep.mubr.msk.f32.mxu1 %vm5989_vm0, %v5990_v23 }
 0x366   :  { %5703 = vmatprep.subr.bf16.mxu1 %v5988_v13 }
 0x369   :  { %5705 = vmatpush3.bf16.msra.mxu1 %v5704_v39 }
 0x36a   :  { %5706 = vmatprep.subr.bf16.mxu1 %v5988_v13 }
 0x36d   :  { %5708 = vmatpush3.bf16.msra.mxu1 %v5707_v37 }
 0x36e   :  { %5709 = vmatprep.subr.bf16.mxu1 %v5988_v13 }
 0x371   :  { %5711 = vmatpush3.bf16.msra.mxu1 %v5710_v58  ;;  %v3441_v58 = vsub.f32 %v6962_v26, %v3440_v31 }
 0x372   :  { %5712 = vmatprep.subr.bf16.mxu1 %v5988_v13 }
 0x373   :  { %v3442_v59 = vand.u32 4294901760, %v3441_v58 }
 0x374   :  { %5157 = vmatmul.mubr.f32.vlgmr.msra.gmra.mrb[4].mxu1 %v6856_v16 }
 0x375   :  { %5714 = vmatpush3.bf16.msra.mxu1 %v6779_v49  ;;  %5175 = vmatprep.mubr.msk.f32.mxu1 %vm5989_vm0, %v5990_v23  ;;  %v3320_v49 = vand.u32 4294901760, %v4354_v27  ;;  %v5815_v7 = vpack.c.bf16 %v3442_v59, %v3435_v9 }
 0x376   :  { %5715 = vmatprep.subr.bf16.mxu1 %v5988_v13 }
 0x377   :  { %v6911_v10 = vsub.f32 %v4354_v27, %v3320_v49  ;;  %v6916_v3 = vpack.c.bf16 %v3323_v0, %v3320_v49  ;;  %v5827_v49 = vpack.c.bf16 %v6962_v26, %v6960_v15  ;;  %v5830_v0 = vpack.c.bf16 %v6977_v38, %v6975_v36 }
 0x379   :  { %5717 = vmatpush3.bf16.msra.mxu1 %v6789_v48  ;;  %v4356_v48 = vld [vmem:[%s7105_s9 + $0x50] sm:$0xff]  ;;  %v3405_v42 = vand.u32 4294901760, %v6911_v10  ;;  %v5821_v56 = vpack.c.bf16 %v6913_v61, %v6911_v10  ;;  %v3859_v61 = vld [vmem:[#allocation2] sm:$0x1] }
 0x37a   :  { %5718 = vmatprep.subr.bf16.mxu1 %v5988_v13  ;;  %3862 = vperm.xlu1 %5958, %v3859_v61  }
 0x37b   :  { %v3406_v50 = vsub.f32 %v6911_v10, %v3405_v42  ;;  %v5854_v10 = vpack.c.bf16 %v3454_v47, %v3447_v46 }
 0x37d   :  { %5720 = vmatpush3.bf16.msra.mxu1 %v6803_v34  ;;  %v3326_v34 = vand.u32 4294901760, %v4356_v48  ;;  %v3407_v20 = vand.u32 4294901760, %v3406_v50  ;;  %v3866_v50 = vshrl.u32 %v7124_v45, 7 }
 0x37e   :  { %5721 = vmatprep.subr.bf16.mxu1 %v5988_v13 }
 0x37f   :  { %v6928_v21 = vsub.f32 %v4356_v48, %v3326_v34  ;;  %v6941_v62 = vpack.c.bf16 %v3329_v1, %v3326_v34  ;;  %v5809_v33 = vpack.c.bf16 %v3414_v12, %v3407_v20  ;;  %v5845_v48 = vpack.c.bf16 %v3412_v54, %v3405_v42 }
 0x380   :  { %v3867_v11 = vsub.s32 0, %v3866_v50 }
 0x381   :  { %5723 = vmatpush3.bf16.msra.mxu1 %v6823_v25  ;;  %v6930_v25 = vsub.f32 %v4357_v5, %v3329_v1  ;;  %v3419_v55 = vand.u32 4294901760, %v6928_v21 }
 0x382   :  { %5796 = vmatprep.subr.bf16.mxu1 %v5988_v13 }
 0x383   :  { %v3426_v44 = vand.u32 4294901760, %v6930_v25  ;;  %v3420_v22 = vsub.f32 %v6928_v21, %v3419_v55  ;;  %v5824_v57 = vpack.c.bf16 %v6930_v25, %v6928_v21 }
 0x384   :  { %5176 = vmatmul.mubr.f32.vlgmr.msra.gmra.mrb[4].mxu1 %v6856_v16  ;;  %v3448_v16 = vsub.f32 %v6975_v36, %v3447_v46 }
 0x385   :  { %5798 = vmatpush3.bf16.msra.mxu1 %v6916_v3  ;;  %5308 = vmatprep.mubr.msk.f32.mxu1 %vm5989_vm0, %v5990_v23  ;;  %v3427_v24 = vsub.f32 %v6930_v25, %v3426_v44  ;;  %v3421_v39 = vand.u32 4294901760, %v3420_v22  ;;  %v5848_v5 = vpack.c.bf16 %v3426_v44, %v3419_v55 }
 0x386   :  { %5799 = vmatprep.subr.bf16.mxu1 %v5988_v13  ;;  %v3449_v40 = vand.u32 4294901760, %v3448_v16 }
 0x387   :  { %v3428_v37 = vand.u32 4294901760, %v3427_v24 }
 0x388   :  { %v5818_v27 = vpack.c.bf16 %v3456_v52, %v3449_v40 }
 0x389   :  { %5801 = vmatpush3.bf16.msra.mxu1 %v6941_v62  ;;  %v5812_v14 = vpack.c.bf16 %v3428_v37, %v3421_v39 }
 0x38a   :  { %5802 = vmatprep.subr.bf16.mxu1 %v5988_v13 }
 0x38d   :  { %5804 = vmatpush3.bf16.msra.mxu1 %v6958_v35 }
 0x38e   :  { %5805 = vmatprep.subr.bf16.mxu1 %v5988_v13 }
 0x391   :  { %5807 = vmatpush3.bf16.msra.mxu1 %v6966_v19 }
 0x392   :  { %5808 = vmatprep.subr.bf16.mxu1 %v5988_v13 }
 0x394   :  { %5309 = vmatmul.mubr.f32.vlgmr.msra.gmra.mrb[4].mxu1 %v3396_v28 }
 0x395   :  { %5810 = vmatpush3.bf16.msra.mxu1 %v5809_v33  ;;  %5327 = vmatprep.mubr.msk.f32.mxu1 %vm5989_vm0, %v5990_v23 }
 0x396   :  { %5811 = vmatprep.subr.bf16.mxu1 %v5988_v13 }
 0x399   :  { %5813 = vmatpush3.bf16.msra.mxu1 %v5812_v14 }
 0x39a   :  { %5814 = vmatprep.subr.bf16.mxu1 %v5988_v13 }
 0x39d   :  { %5816 = vmatpush3.bf16.msra.mxu1 %v5815_v7 }
 0x39e   :  { %5817 = vmatprep.subr.bf16.mxu1 %v5988_v13 }
 0x3a1   :  { %5819 = vmatpush3.bf16.msra.mxu1 %v5818_v27 }
 0x3a2   :  { %5820 = vmatprep.subr.bf16.mxu1 %v5988_v13 }
 0x3a4   :  { %5328 = vmatmul.mubr.f32.vlgmr.msra.gmra.mrb[4].mxu1 %v6918_v29 }
 0x3a5   :  { %5822 = vmatpush3.bf16.msra.mxu1 %v5821_v56  ;;  %5346 = vmatprep.mubr.msk.f32.mxu1 %vm5989_vm0, %v5990_v23 }
 0x3a6   :  { %5823 = vmatprep.subr.bf16.mxu1 %v5988_v13 }
 0x3a9   :  { %5825 = vmatpush3.bf16.msra.mxu1 %v5824_v57 }
 0x3aa   :  { %5826 = vmatprep.subr.bf16.mxu1 %v5988_v13 }
 0x3ad   :  { %5828 = vmatpush3.bf16.msra.mxu1 %v5827_v49 }
 0x3ae   :  { %5829 = vmatprep.subr.bf16.mxu1 %v5988_v13 }
 0x3b1   :  { %5831 = vmatpush3.bf16.msra.mxu1 %v5830_v0 }
 0x3b2   :  { %5832 = vmatprep.subr.bf16.mxu1 %v5988_v13 }
 0x3b4   :  { %5347 = vmatmul.mubr.f32.vlgmr.msra.gmra.mrb[4].mxu1 %v6946_v17 }
 0x3b5   :  { %5834 = vmatpush3.bf16.msra.mxu1 %v6916_v3  ;;  %5365 = vmatprep.mubr.msk.f32.mxu1 %vm5989_vm0, %v5990_v23 }
 0x3b6   :  { %5835 = vmatprep.subr.bf16.mxu1 %v5988_v13 }
 0x3b9   :  { %5837 = vmatpush3.bf16.msra.mxu1 %v6941_v62 }
 0x3ba   :  { %5838 = vmatprep.subr.bf16.mxu1 %v5988_v13 }
 0x3bd   :  { %5840 = vmatpush3.bf16.msra.mxu1 %v6958_v35 }
 0x3be   :  { %5841 = vmatprep.subr.bf16.mxu1 %v5988_v13 }
 0x3c1   :  { %5843 = vmatpush3.bf16.msra.mxu1 %v6966_v19 }
 0x3c2   :  { %5844 = vmatprep.subr.bf16.mxu1 %v5988_v13 }
 0x3c4   :  { %5366 = vmatmul.mubr.f32.vlgmr.msra.gmra.mrb[4].mxu1 %v3394_v18 }
 0x3c5   :  { %5846 = vmatpush3.bf16.msra.mxu1 %v5845_v48  ;;  %5384 = vmatprep.mubr.msk.f32.mxu1 %vm5989_vm0, %v5990_v23 }
 0x3c6   :  { %5847 = vmatprep.subr.bf16.mxu1 %v5988_v13 }
 0x3c9   :  { %5849 = vmatpush3.bf16.msra.mxu1 %v5848_v5 }
 0x3ca   :  { %5850 = vmatprep.subr.bf16.mxu1 %v5988_v13 }
 0x3cd   :  { %5852 = vmatpush3.bf16.msra.mxu1 %v5851_v6 }
 0x3ce   :  { %5853 = vmatprep.subr.bf16.mxu1 %v5988_v13 }
 0x3d1   :  { %5855 = vmatpush3.bf16.msra.mxu1 %v5854_v10 }
 0x3d2   :  { %5856 = vmatprep.subr.bf16.mxu1 %v5988_v13 }
 0x3d4   :  { %5385 = vmatmul.mubr.f32.vlgmr.msra.gmra.mrb[4].mxu1 %v6918_v29 }
 0x3d5   :  { %5858 = vmatpush3.bf16.msra.mxu1 %v6916_v3  ;;  %5403 = vmatprep.mubr.msk.f32.mxu1 %vm5989_vm0, %v5990_v23  ;;  %v3858_v3 = vld [vmem:[%s7108_s12] sm:$0x1]  ;;  %s4329_s12 = sshll.u32 %s5991_s11, 4  ;;  %s4330_s12 = int_to_ptr.vmem [resolvable:$true] %s4329_s12 }
 0x3d6   :  { %5859 = vmatprep.subr.bf16.mxu1 %v5988_v13  ;;  %v3870_v34 = vsel %vm92_vm4, %v3858_v3, 0  ;;  %s5960_s10 = scalar_lea.vmem %s4330_s12, 16  ;;  %s5964_s3 = scalar_lea.vmem %s4330_s12, 32 }
 0x3d7   :  { %v3941_v1 = vand.u32 4294901760, %v3870_v34  ;;  %p5961_p0 = scmp.ne.s32.totalorder %s4330_s12, %s5960_s10  ;;  %p5965_p1 = scmp.lt.s32.totalorder %s4330_s12, %s4330_s12 }
 0x3d8   :  { %p5966_p2 = scmp.lt.s32.totalorder %s5964_s3, %s5960_s10 }
 0x3d9   :  { %5861 = vmatpush3.bf16.msra.mxu1 %v6941_v62  ;;  %v3942_v60 = vsub.f32 %v3870_v34, %v3941_v1 }
 0x3da   :  { %5862 = vmatprep.subr.bf16.mxu1 %v5988_v13  ;;  %p5967_p3 = por %p5966_p2, %p5965_p1 }
 0x3db   :  { %v3943_v21 = vand.u32 4294901760, %v3942_v60 }
 0x3dc   :  { %p5968_p4 = pnand %p5967_p3, %p5961_p0 }
 0x3dd   :  { %5864 = vmatpush3.bf16.msra.mxu1 %v6958_v35 }
 0x3de   :  { %5865 = vmatprep.subr.bf16.mxu1 %v5988_v13 }
 0x3e1   :  { %5867 = vmatpush3.bf16.msra.mxu1 %v6966_v19 }
 0x3e4   :  { %5404 = vmatmul.mubr.f32.vlgmr.msra.gmra.mrb[4].mxu1 %v6918_v29  ;;  %v3944_v29 = vsub.f32 %v3942_v60, %v3943_v21 }
 0x3e6   :  { %v3945_v62 = vand.u32 4294901760, %v3944_v29 }
 0x3f9   :  { %v3863_v55 = vpop.permute.xlu1 %3862 }
 0x3fa   :  { %v3868_v44 = vrot.slane %v3863_v55, %v3867_v11 }
 0x4b7   :  { %v3852_v13 = vpop.f32.mrb[4].mxu1 }
 0x4b8   :  { %v5869_v25 = vadd.f32 %v4345_v2, %v3852_v13  ;;  %v5405_v4 = vpop.f32.mrb[5].mxu1 }
 0x4ba   :  { %v3857_v8 = vmax.f32 %v5869_v25, 0.0 }
 0x4bc   :  { %v3873_v42 = vsel %vm92_vm4, %v3857_v8, 0 }
 0x4bd   :  { %v3876_v54 = vand.u32 4294901760, %v3873_v42 }
 0x4bf   :  { %v3953_v63 = vsub.f32 %v3873_v42, %v3876_v54  ;;  %5407 = vmatpush3.xpose.msra.mxu0 %v3876_v54 }
 0x4c0   :  { %5411 = vmatprep.subr.mxu0 %v5990_v23 }
 0x4c1   :  { %v3954_v51 = vand.u32 4294901760, %v3953_v63 }
 0x4c2   :  { %5409 = vmatmul.mubr.f32.vlgmr.msra.gmra.mrb[14].mxu0 %v3945_v62 }
 0x4c3   :  { %v3955_v17 = vsub.f32 %v3953_v63, %v3954_v51  ;;  %5413 = vmatprep.mubr.msk.f32.mxu0 %vm5989_vm0, %v5990_v23 }
 0x4c5   :  { %v3956_v53 = vand.u32 4294901760, %v3955_v17 }
 0x4c7   :  { %5412 = vmatpush3.xpose.msra.mxu0 %v3956_v53 }
 0x4c8   :  { %5416 = vmatprep.subr.mxu0 %v5990_v23 }
 0x4ca   :  { %5414 = vmatmul.mubr.f32.vlgmr.msra.gmra.mrb[14].mxu0 %v3941_v1 }
 0x4cb   :  { %5417 = vmatpush3.xpose.msra.mxu0 %v3953_v63  ;;  %5418 = vmatprep.mubr.msk.f32.mxu0 %vm5989_vm0, %v5990_v23 }
 0x4cc   :  { %5421 = vmatprep.subr.mxu0 %v5990_v23 }
 0x4d2   :  { %5419 = vmatmul.mubr.f32.vlgmr.msra.gmra.mrb[14].mxu0 %v3942_v60 }
 0x4d3   :  { %5422 = vmatpush3.xpose.msra.mxu0 %v3876_v54  ;;  %5423 = vmatprep.mubr.msk.f32.mxu0 %vm5989_vm0, %v5990_v23 }
 0x4d4   :  { %5426 = vmatprep.subr.mxu0 %v5990_v23 }
 0x4da   :  { %5424 = vmatmul.mubr.f32.vlgmr.msra.gmra.mrb[14].mxu0 %v3943_v21 }
 0x4db   :  { %5427 = vmatpush3.xpose.msra.mxu0 %v3954_v51  ;;  %5428 = vmatprep.mubr.msk.f32.mxu0 %vm5989_vm0, %v5990_v23 }
 0x4dc   :  { %5431 = vmatprep.subr.mxu0 %v5990_v23 }
 0x4e2   :  { %5429 = vmatmul.mubr.f32.vlgmr.msra.gmra.mrb[14].mxu0 %v3941_v1 }
 0x4e3   :  { %5432 = vmatpush3.xpose.msra.mxu0 %v3876_v54  ;;  %5433 = vmatprep.mubr.msk.f32.mxu0 %vm5989_vm0, %v5990_v23 }
 0x4ea   :  { %5434 = vmatmul.mubr.f32.vlgmr.msra.gmra.mrb[14].mxu0 %v3941_v1 }
 0x5bd   :  { %v4317_v35 = vpop.f32.mrb[14].mxu0 }
 0x5be   :  { %v5871_v15 = vadd.f32 %v4317_v35, %v3868_v44  ;;  %v5435_v26 = vpop.f32.mrb[15].mxu0 }
 0x5c0   :  { %4322 = vst.msk [vmem:[#allocation3] sm:$0x1] %vm4321_vm6, %v5871_v15 }
 0x5c1   :  { %5971 = shalt.err (!%p5968_p4)
}
 0x5c2   :  { %s5972_s4 = scalar_lea.hbm %s7110_s14, 16 }
 0x5c3   :  { %p5973_p5 = scmp.ne.s32.totalorder %s7110_s14, %s5972_s4  ;;  %p5976_p6 = scmp.lt.u32.totalorder %s5972_s4, %s7110_s14 }
 0x5c5   :  { %p5978_p7 = pnand %p5976_p6, %p5973_p5 }
 0x5c7   :  { %5981 = shalt.err (!%p5978_p7)
}
 0x5c8   :  { %4332 = dma.vmem_to_hbm [thread:$0]  %s4330_s12, 16, %s7110_s14, [#allocation4]  }
 0x5c9   :  { %5982 = dma.done.wait [#allocation4], 16  }
 0x5ca   :  { %5983 = vsyncadd [#allocation4], 4294967280 }
 0x5cb   :  { %4336 = vsyncpa [#allocation4], 1 }

</bundles_post_ra>
